<compile_context>
chip_gen: v6e
topology: v6e:2x2x1
jax: 0.10.0
libtpu: 0.0.40
codegen_flags: <defaults>
</compile_context>

<pallas_src>
import functools

import jax
import jax.numpy as jnp
from jax import lax
from jax.experimental import pallas as pl
from jax.experimental.pallas import tpu as pltpu

_LANES = 128


def _clip_head_kernel(txt_ref, img_ref, w_ref, txt_emb_ref, img_emb_ref, cos_ref):
    """One batch tile: fused projection matmul + cosine-similarity epilogue.

    txt_ref:     (Bt, Ht)        pooled text-tower hidden states
    img_ref:     (Bt, Hv)        pooled vision-tower hidden states
    w_ref:       (Ht+Hv, 2*Dp)   block-diagonal [[w_txt, 0], [0, w_img]]
    txt_emb_ref: (Bt, Dp)        text embeddings
    img_emb_ref: (Bt, Dp)        image embeddings
    cos_ref:     (Bt, 128)       cosine similarity broadcast across lanes
    """
    d = txt_emb_ref.shape[-1]

    # Fused projection: one MXU push over the block-diagonal weight.
    # (For the real model Ht/Hv are multiples of 128, so this concat is
    #  lane-aligned and cheap.)
    z = jnp.concatenate([txt_ref[...], img_ref[...]], axis=-1)          # (Bt, Ht+Hv)
    proj = jnp.dot(z, w_ref[...], preferred_element_type=jnp.float32)   # (Bt, 2*Dp)
    t = proj[:, :d]      # text embeddings  (f32 accumulators)
    im = proj[:, d:]     # image embeddings (f32 accumulators)

    # Cosine epilogue on the f32 accumulators, before the output casts/stores.
    dot = jnp.sum(im * t, axis=-1, keepdims=True)
    t2 = jnp.sum(t * t, axis=-1, keepdims=True)
    i2 = jnp.sum(im * im, axis=-1, keepdims=True)
    eps2 = jnp.float32(1e-8 * 1e-8)  # torch eps=1e-8, applied on squared norms
    inv_denom = lax.rsqrt(jnp.maximum(t2, eps2) * jnp.maximum(i2, eps2))  # EUP
    cos = dot * inv_denom                                                # (Bt, 1)
    cos_ref[...] = jnp.broadcast_to(cos, cos_ref.shape).astype(cos_ref.dtype)

    # Write the (large) embedding tiles last to keep vreg pressure low.
    txt_emb_ref[...] = t.astype(txt_emb_ref.dtype)
    img_emb_ref[...] = im.astype(img_emb_ref.dtype)


def _round_up(x, m):
    return (x + m - 1) // m * m


@functools.partial(jax.jit, static_argnames=("block_rows",))
def clip_forward(txt_pooled, img_pooled, w_txt, w_img, *, block_rows=512):
    """Returns (text_embeddings, image_embeddings, cosine_similarity[B, 1])."""
    B, Ht = txt_pooled.shape
    Bi, Hv = img_pooled.shape
    assert B == Bi
    D = w_txt.shape[1]
    assert w_txt.shape == (Ht, D) and w_img.shape == (Hv, D)

    # Lane-dense projection dim (the real CLIP D=512 already satisfies this).
    Dp = _round_up(D, _LANES)
    # Batch tile: multiple of 8 sublanes, capped at block_rows.
    bt = _round_up(min(block_rows, _round_up(B, 8)), 8)
    Bp = _round_up(B, bt)

    if Bp != B:
        txt_pooled = jnp.pad(txt_pooled, ((0, Bp - B), (0, 0)))
        img_pooled = jnp.pad(img_pooled, ((0, Bp - B), (0, 0)))

    # Block-diagonal fused projection weight (built once, outside the kernel).
    w_fused = jnp.zeros((Ht + Hv, 2 * Dp), dtype=jnp.float32)
    w_fused = w_fused.at[:Ht, :D].set(w_txt.astype(jnp.float32))
    w_fused = w_fused.at[Ht:, Dp:Dp + D].set(w_img.astype(jnp.float32))

    grid = (Bp // bt,)

    cost = pl.CostEstimate(
        flops=2 * Bp * (Ht + Hv) * (2 * Dp),
        transcendentals=Bp,  # one rsqrt per row
        bytes_accessed=4 * (Bp * (Ht + Hv) + (Ht + Hv) * 2 * Dp
                            + 2 * Bp * Dp + Bp * _LANES),
    )

    out_shapes = (
        jax.ShapeDtypeStruct((Bp, Dp), jnp.float32),      # text embeddings
        jax.ShapeDtypeStruct((Bp, Dp), jnp.float32),      # image embeddings
        jax.ShapeDtypeStruct((Bp, _LANES), jnp.float32),  # cosine (lane-broadcast)
    )

    txt_emb, img_emb, cos_wide = pl.pallas_call(
        _clip_head_kernel,
        out_shape=out_shapes,
        grid=grid,
        in_specs=[
            pl.BlockSpec((bt, Ht), lambda i: (i, 0)),
            pl.BlockSpec((bt, Hv), lambda i: (i, 0)),
            pl.BlockSpec((Ht + Hv, 2 * Dp), lambda i: (0, 0)),  # weights pinned
        ],
        out_specs=(
            pl.BlockSpec((bt, Dp), lambda i: (i, 0)),
            pl.BlockSpec((bt, Dp), lambda i: (i, 0)),
            pl.BlockSpec((bt, _LANES), lambda i: (i, 0)),
        ),
        compiler_params=pltpu.CompilerParams(
            dimension_semantics=("parallel",),       # shard batch across TCs (v7x)
            vmem_limit_bytes=32 * 1024 * 1024,       # safe on v5e/v6e/v7x
        ),
        cost_estimate=cost,
    )(txt_pooled, img_pooled, w_fused)

    text_embeddings = txt_emb[:B, :D]
    image_embeddings = img_emb[:B, :D]
    cosine_similarity = cos_wide[:B, :1]
    return text_embeddings, image_embeddings, cosine_similarity


def _reference(txt_pooled, img_pooled, w_txt, w_img):
    t = txt_pooled @ w_txt
    im = img_pooled @ w_img
    eps = 1e-8
    dot = jnp.sum(im * t, axis=-1, keepdims=True)
    tn = jnp.maximum(jnp.linalg.norm(t, axis=-1, keepdims=True), eps)
    inorm = jnp.maximum(jnp.linalg.norm(im, axis=-1, keepdims=True), eps)
    return t, im, dot / (tn * inorm)


if __name__ == "__main__":
    # Small, lane-dense stand-in shapes. The real clip-italian towers use
    # hidden=768 and projection dim D=512 — also multiples of 128, so the
    # same tiling applies unchanged at real scale.
    B, Ht, Hv, D = 256, 128, 128, 256

    key = jax.random.PRNGKey(0)
    k1, k2, k3, k4 = jax.random.split(key, 4)

    # Synthetic pooled tower outputs (stand-ins for frozen BERT/ViT pooled states).
    txt_pooled = jax.random.normal(k1, (B, Ht), dtype=jnp.float32)
    img_pooled = jax.random.normal(k2, (B, Hv), dtype=jnp.float32)

    # Deterministic projection weights (text_projection / visual_projection).
    w_txt = jax.random.normal(k3, (Ht, D), dtype=jnp.float32) * 0.02
    w_img = jax.random.normal(k4, (Hv, D), dtype=jnp.float32) * 0.02

    text_emb, image_emb, cos = clip_forward(
        txt_pooled, img_pooled, w_txt, w_img, block_rows=128)  # grid = (2,)
    jax.block_until_ready((text_emb, image_emb, cos))

    # Correctness check against a pure-JAX reference.
    t_ref, i_ref, c_ref = _reference(txt_pooled, img_pooled, w_txt, w_img)
    assert text_emb.shape == (B, D) and image_emb.shape == (B, D) and cos.shape == (B, 1)
    assert jnp.allclose(text_emb, t_ref, atol=1e-5, rtol=1e-5)
    assert jnp.allclose(image_emb, i_ref, atol=1e-5, rtol=1e-5)
    assert jnp.allclose(cos, c_ref, atol=1e-4, rtol=1e-4)

    print("KERNEL_OK")
</pallas_src>

<mosaic_0001>
module attributes {stable_mosaic.version = 11 : i64} {
  func.func @_clip_head_kernel(%arg0: i32, %arg1: memref<128x128xf32, #tpu.memory_space<vmem>>, %arg2: memref<128x128xf32, #tpu.memory_space<vmem>>, %arg3: memref<256x512xf32, #tpu.memory_space<vmem>>, %arg4: memref<128x256xf32, #tpu.memory_space<vmem>>, %arg5: memref<128x256xf32, #tpu.memory_space<vmem>>, %arg6: memref<128x128xf32, #tpu.memory_space<vmem>>) attributes {dimension_semantics = [#tpu.dimension_semantics<parallel>], iteration_bounds = array<i64: 2>, scalar_prefetch = 0 : i64, scratch_operands = 0 : i64, tpu.core_type = #tpu.core_type<tc>, window_params = [{transform_indices = @transform_0, window_bounds = array<i64: 128, 128>}, {transform_indices = @transform_1, window_bounds = array<i64: 128, 128>}, {pipeline_mode = #tpu.pipeline_mode<synchronous>, transform_indices = @transform_2, window_bounds = array<i64: 256, 512>}, {transform_indices = @transform_3, window_bounds = array<i64: 128, 256>}, {transform_indices = @transform_4, window_bounds = array<i64: 128, 256>}, {transform_indices = @transform_5, window_bounds = array<i64: 128, 128>}]} {
    %c0 = arith.constant 0 : index
    %c0_0 = arith.constant 0 : index
    %0 = vector.load %arg1[%c0, %c0_0] : memref<128x128xf32, #tpu.memory_space<vmem>>, vector<128x128xf32>
    %c0_1 = arith.constant 0 : index
    %c0_2 = arith.constant 0 : index
    %1 = vector.load %arg2[%c0_1, %c0_2] : memref<128x128xf32, #tpu.memory_space<vmem>>, vector<128x128xf32>
    %2 = tpu.concatenate %0, %1 in 1 : vector<128x128xf32>, vector<128x128xf32> -> vector<128x256xf32>
    %c0_3 = arith.constant 0 : index
    %c0_4 = arith.constant 0 : index
    %3 = vector.load %arg3[%c0_3, %c0_4] : memref<256x512xf32, #tpu.memory_space<vmem>>, vector<256x512xf32>
    %cst = arith.constant dense<0.000000e+00> : vector<128x512xf32>
    %4 = tpu.matmul %2, %3, %cst {dimension_numbers = #tpu.dot_dimension_numbers<[1], [0], [0], [1], [0, 0, 1, 1], [], []>} : vector<128x256xf32>, vector<256x512xf32>, vector<128x512xf32> -> vector<128x512xf32>
    %5 = vector.extract_strided_slice %4 {offsets = [0, 0], sizes = [128, 256], strides = [1, 1]} : vector<128x512xf32> to vector<128x256xf32>
    %6 = vector.extract_strided_slice %4 {offsets = [0, 256], sizes = [128, 256], strides = [1, 1]} : vector<128x512xf32> to vector<128x256xf32>
    %7 = arith.mulf %6, %5 : vector<128x256xf32>
    %cst_5 = arith.constant dense<0.000000e+00> : vector<128xf32>
    %8 = vector.multi_reduction <add>, %7, %cst_5 [1] : vector<128x256xf32> to vector<128xf32>
    %9 = vector.shape_cast %8 : vector<128xf32> to vector<128x1xf32>
    %10 = arith.mulf %5, %5 : vector<128x256xf32>
    %cst_6 = arith.constant dense<0.000000e+00> : vector<128xf32>
    %11 = vector.multi_reduction <add>, %10, %cst_6 [1] : vector<128x256xf32> to vector<128xf32>
    %12 = vector.shape_cast %11 : vector<128xf32> to vector<128x1xf32>
    %13 = arith.mulf %6, %6 : vector<128x256xf32>
    %cst_7 = arith.constant dense<0.000000e+00> : vector<128xf32>
    %14 = vector.multi_reduction <add>, %13, %cst_7 [1] : vector<128x256xf32> to vector<128xf32>
    %15 = vector.shape_cast %14 : vector<128xf32> to vector<128x1xf32>
    %cst_8 = arith.constant 1.000000e-16 : f32
    %16 = vector.broadcast %cst_8 : f32 to vector<128x1xf32>
    %17 = arith.maximumf %12, %16 : vector<128x1xf32>
    %cst_9 = arith.constant 1.000000e-16 : f32
    %18 = vector.broadcast %cst_9 : f32 to vector<128x1xf32>
    %19 = arith.maximumf %15, %18 : vector<128x1xf32>
    %20 = arith.mulf %17, %19 : vector<128x1xf32>
    %21 = math.rsqrt %20 : vector<128x1xf32>
    %22 = arith.mulf %9, %21 : vector<128x1xf32>
    %23 = vector.shape_cast %22 : vector<128x1xf32> to vector<128x1xf32>
    %24 = vector.broadcast %23 : vector<128x1xf32> to vector<128x128xf32>
    %c0_10 = arith.constant 0 : index
    %c0_11 = arith.constant 0 : index
    %25 = vector.load %arg6[%c0_10, %c0_11] : memref<128x128xf32, #tpu.memory_space<vmem>>, vector<128x128xf32>
    tpu.vector_store %arg6[%c0_10, %c0_11], %24 {strides = array<i32>} : memref<128x128xf32, #tpu.memory_space<vmem>>, vector<128x128xf32>,
    %c0_12 = arith.constant 0 : index
    %c0_13 = arith.constant 0 : index
    %26 = vector.load %arg4[%c0_12, %c0_13] : memref<128x256xf32, #tpu.memory_space<vmem>>, vector<128x256xf32>
    tpu.vector_store %arg4[%c0_12, %c0_13], %5 {strides = array<i32>} : memref<128x256xf32, #tpu.memory_space<vmem>>, vector<128x256xf32>,
    %c0_14 = arith.constant 0 : index
    %c0_15 = arith.constant 0 : index
    %27 = vector.load %arg5[%c0_14, %c0_15] : memref<128x256xf32, #tpu.memory_space<vmem>>, vector<128x256xf32>
    tpu.vector_store %arg5[%c0_14, %c0_15], %6 {strides = array<i32>} : memref<128x256xf32, #tpu.memory_space<vmem>>, vector<128x256xf32>,
    return
  }
  func.func @transform_0(%arg0: i32) -> (i32, i32) {
    %c0_i32 = arith.constant 0 : i32
    %c0_i32_0 = arith.constant 0 : i32
    return %arg0, %c0_i32 : i32, i32
  }
  func.func @transform_1(%arg0: i32) -> (i32, i32) {
    %c0_i32 = arith.constant 0 : i32
    %c0_i32_0 = arith.constant 0 : i32
    return %arg0, %c0_i32 : i32, i32
  }
  func.func @transform_2(%arg0: i32) -> (i32, i32) {
    %c0_i32 = arith.constant 0 : i32
    %c0_i32_0 = arith.constant 0 : i32
    %c0_i32_1 = arith.constant 0 : i32
    return %c0_i32, %c0_i32_0 : i32, i32
  }
  func.func @transform_3(%arg0: i32) -> (i32, i32) {
    %c0_i32 = arith.constant 0 : i32
    %c0_i32_0 = arith.constant 0 : i32
    return %arg0, %c0_i32 : i32, i32
  }
  func.func @transform_4(%arg0: i32) -> (i32, i32) {
    %c0_i32 = arith.constant 0 : i32
    %c0_i32_0 = arith.constant 0 : i32
    return %arg0, %c0_i32 : i32, i32
  }
  func.func @transform_5(%arg0: i32) -> (i32, i32) {
    %c0_i32 = arith.constant 0 : i32
    %c0_i32_0 = arith.constant 0 : i32
    return %arg0, %c0_i32 : i32, i32
  }
}

</mosaic_0001>

<bundles_post_ra>
// kernel: clip_forward.1
= control target key start
LH: loop header
LB: loop body
LE: loop exit
PB: predicated region body
PF: predicated region fallthrough
CT: control target
= control target key end

     0   :  { %11 = vsyncpa [#allocation3], 0  ;;  %s2473_s0 = inlined_call_operand.vmem [shape: f32[256,128], index: 0, kind: input, shape index: {}]   ;;  %s2474_s1 = inlined_call_operand.vmem [shape: f32[256,128], index: 1, kind: input, shape index: {}]   ;;  %s2475_s2 = inlined_call_operand.vmem [shape: f32[256,512], index: 2, kind: input, shape index: {}]   ;;  %s2476_s3 = inlined_call_operand.hbm [shape: f32[256,256], index: 3, kind: output, shape index: {0}]   ;;  %s2477_s4 = inlined_call_operand.hbm [shape: f32[256,256], index: 4, kind: output, shape index: {1}]   ;;  %s2478_s5 = inlined_call_operand.vmem [shape: f32[256,128], index: 5, kind: output, shape index: {2}]  }
   0x1   :  { %13 = vsyncpa [#allocation3 + $0x1], 0 }
   0x2   :  { %14 = vsyncpa [#allocation5], 0 }
   0x3   :  { %16 = vsyncpa [#allocation5 + $0x1], 0  ;;  %s1562_s18 = smov 0   ;;  %s1564_s19 = smov 0  }
   0x4   :  { %s1566_s20 = smov 0   ;;  %s1568_s21 = smov 0  }
   0x5 LB: > { %s1583_s22 = sadd.s32 4294967295, %s1526_s21   ;;  %s1332_s23 = sadd.s32 4294967294, %s1526_s21   ;;  %s1526_s21 = sphi %s1568_s21, %s2485_s21   ;;  %s1522_s20 = sphi %s1566_s20, %s2484_s20   ;;  %s1518_s19 = sphi %s1564_s19, %s2483_s19   ;;  %s1514_s18 = sphi %s1562_s18, %s2482_s18  }
   0x6   : > { %s1587_s24 = sadd.s32 1, %s1526_s21   ;;  %s102_s25 = sadd.s32 1, %s1522_s20 }
   0x7   : > { %s99_s26 = ssub.s32 %s1526_s21, %s1587_s24  ;;  %p112_p0 = scmp.ne.s32.totalorder %s1522_s20, %s1518_s19 }
   0x8   : > { %p100_p1 = scmp.eq.s32.totalorder %s99_s26, 0  ;;  %p113_p2 = scmp.eq.s32.totalorder %s1583_s22, 1 }
   0x9   : > { %p118_p3 = scmp.ne.s32.totalorder %s1518_s19, %s1514_s18  ;;  %p119_p4 = scmp.eq.s32.totalorder %s1332_s23, 1 }
   0xa   : > { %s1598_s27 = scalar_select %p100_p1, %s1522_s20, %s102_s25  }
   0xb   : > { %p1600_p5 = por %p113_p2, %p112_p0  ;;  %p1604_p6 = por %p119_p4, %p118_p3 }
   0xc   : > { %p1335_p7 = scmp.ge.s32.totalorder %s1526_s21, 1  ;;  %p210_p8 = scmp.lt.s32.totalorder %s1526_s21, 3 }
   0xe   : > { %p211_p9 = pnand %p1335_p7, %p210_p8 }
   0xf   : > { %s1338_s17 = sshll.u32 (!%p211_p9), %s1583_s22, 4  ;;  %s2052_s30 = sand.u32 (!%p211_p9), 1, %s1518_s19  }
  0x10   : > { %214 = sbr.rel (%p211_p9) target bundleno = 519 (0x207), region = 32  ;;  %p1913_p10 = scmp.lt.s32.totalorder (!%p211_p9), %s1338_s17, 31 }
  0x11   : > { %s1336_s6 = sshll.u32 (!%p211_p9), %s2052_s30, 8  ;;  %s1355_s8 = sshll.u32 (!%p211_p9), %s1583_s22, 12 }
  0x12   : > { %s2055_s7 = scalar_lea.vmem (!%p211_p9), [#allocation2], %s1336_s6  ;;  %s2370_s10 = scalar_lea.hbm (!%p211_p9), %s2476_s3, %s1355_s8 }
  0x13   : > { %s1180_s9 = sshll.u32 (!%p211_p9), %s2055_s7, 4  ;;  %s1156_s11 = scalar_lea.sflag (!%p211_p9), [#allocation3], %s2052_s30  ;;  %s2372_s9 = int_to_ptr.vmem [resolvable:$true] %s1180_s9 }
  0x14   : > { %s1528_s13 = smov (!%p211_p9), [#allocation2]  }
  0x15   : > { %v366_v0 = vld [vmem:[%s2475_s2 + $0x1e8] sm:$0xff]  ;;  %v368_v1 = vld [vmem:[%s2475_s2 + $0x1f8] sm:$0xff]  ;;  %v365_v2 = vld [vmem:[%s2475_s2 + $0x1e0] sm:$0xff]  ;;  %s2487_s17 = smov (!%p1913_p10, %s1338_s17), 31  ;;  %s1440_s15 = sshll.u32 %s1528_s13, 4  ;;  %s1441_s15 = int_to_ptr.vmem [resolvable:$false] %s1440_s15 }
  0x16   : > { %433 = vmatprep.subr.mxu0 %v366_v0  ;;  %594 = vmatprep.subr.mxu1 %v368_v1  ;;  %v367_v3 = vld [vmem:[%s2475_s2 + $0x1f0] sm:$0xff]  ;;  %v362_v4 = vld [vmem:[%s2475_s2 + $0x1c8] sm:$0xff]  ;;  %v364_v5 = vld [vmem:[%s2475_s2 + $0x1d8] sm:$0xff]  ;;  %s1969_s25 = sshll.u32 %s2487_s17, 3  ;;  %s1442_s16 = scalar_lea.vmem %s1441_s15, 8192 }
  0x17   : > { %434 = vmatpush1.msra.mxu0 %v365_v2  ;;  %595 = vmatpush1.msra.mxu1 %v367_v3  ;;  %v361_v6 = vld [vmem:[%s2475_s2 + $0x1c0] sm:$0xff]  ;;  %v363_v7 = vld [vmem:[%s2475_s2 + $0x1d0] sm:$0xff]  ;;  %v358_v8 = vld [vmem:[%s2475_s2 + $0x1a8] sm:$0xff]  ;;  %s1993_s23 = scalar_lea.vmem %s2474_s1, %s1969_s25  ;;  %s2011_s12 = scalar_lea.vmem %s2473_s0, %s1969_s25 }
  0x18   : > { %435 = vmatprep.subr.mxu0 %v362_v4  ;;  %596 = vmatprep.subr.mxu1 %v364_v5  ;;  %v360_v9 = vld [vmem:[%s2475_s2 + $0x1b8] sm:$0xff]  ;;  %v357_v10 = vld [vmem:[%s2475_s2 + $0x1a0] sm:$0xff]  ;;  %v359_v11 = vld [vmem:[%s2475_s2 + $0x1b0] sm:$0xff]  ;;  %p1443_p0 = scmp.lt.s32.totalorder %s2372_s9, %s1441_s15 }
  0x19   : > { %436 = vmatpush1.msra.mxu0 %v361_v6  ;;  %597 = vmatpush1.msra.mxu1 %v363_v7  ;;  %v354_v12 = vld [vmem:[%s2475_s2 + $0x188] sm:$0xff]  ;;  %v356_v13 = vld [vmem:[%s2475_s2 + $0x198] sm:$0xff]  ;;  %v353_v14 = vld [vmem:[%s2475_s2 + $0x180] sm:$0xff] }
  0x1a   : > { %437 = vmatprep.subr.mxu0 %v358_v8  ;;  %598 = vmatprep.subr.mxu1 %v360_v9  ;;  %v355_v15 = vld [vmem:[%s2475_s2 + $0x190] sm:$0xff]  ;;  %v350_v16 = vld [vmem:[%s2475_s2 + $0x168] sm:$0xff]  ;;  %v352_v17 = vld [vmem:[%s2475_s2 + $0x178] sm:$0xff] }
  0x1b   : > { %438 = vmatpush1.msra.mxu0 %v357_v10  ;;  %599 = vmatpush1.msra.mxu1 %v359_v11  ;;  %v349_v18 = vld [vmem:[%s2475_s2 + $0x160] sm:$0xff]  ;;  %v351_v19 = vld [vmem:[%s2475_s2 + $0x170] sm:$0xff]  ;;  %v346_v20 = vld [vmem:[%s2475_s2 + $0x148] sm:$0xff] }
  0x1c   : > { %439 = vmatprep.subr.mxu0 %v354_v12  ;;  %600 = vmatprep.subr.mxu1 %v356_v13  ;;  %v348_v21 = vld [vmem:[%s2475_s2 + $0x158] sm:$0xff]  ;;  %v345_v22 = vld [vmem:[%s2475_s2 + $0x140] sm:$0xff]  ;;  %v347_v23 = vld [vmem:[%s2475_s2 + $0x150] sm:$0xff] }
  0x1d   : > { %440 = vmatpush1.msra.mxu0 %v353_v14  ;;  %601 = vmatpush1.msra.mxu1 %v355_v15  ;;  %v342_v24 = vld [vmem:[%s2475_s2 + $0x128] sm:$0xff]  ;;  %v344_v25 = vld [vmem:[%s2475_s2 + $0x138] sm:$0xff]  ;;  %v341_v26 = vld [vmem:[%s2475_s2 + $0x120] sm:$0xff] }
  0x1e   : > { %441 = vmatprep.subr.mxu0 %v350_v16  ;;  %602 = vmatprep.subr.mxu1 %v352_v17  ;;  %v343_v27 = vld [vmem:[%s2475_s2 + $0x130] sm:$0xff]  ;;  %v338_v28 = vld [vmem:[%s2475_s2 + $0x108] sm:$0xff]  ;;  %v340_v29 = vld [vmem:[%s2475_s2 + $0x118] sm:$0xff] }
  0x1f   : > { %442 = vmatpush1.msra.mxu0 %v349_v18  ;;  %603 = vmatpush1.msra.mxu1 %v351_v19  ;;  %v337_v30 = vld [vmem:[%s2475_s2 + $0x100] sm:$0xff]  ;;  %v339_v31 = vld [vmem:[%s2475_s2 + $0x110] sm:$0xff]  ;;  %v334_v32 = vld [vmem:[%s2475_s2 + $0xe8] sm:$0xff] }
  0x20   : > { %443 = vmatprep.subr.mxu0 %v346_v20  ;;  %604 = vmatprep.subr.mxu1 %v348_v21  ;;  %v336_v33 = vld [vmem:[%s2475_s2 + $0xf8] sm:$0xff]  ;;  %v333_v34 = vld [vmem:[%s2475_s2 + $0xe0] sm:$0xff]  ;;  %v335_v35 = vld [vmem:[%s2475_s2 + $0xf0] sm:$0xff] }
  0x21   : > { %444 = vmatpush1.msra.mxu0 %v345_v22  ;;  %605 = vmatpush1.msra.mxu1 %v347_v23  ;;  %v330_v36 = vld [vmem:[%s2475_s2 + $0xc8] sm:$0xff]  ;;  %v332_v37 = vld [vmem:[%s2475_s2 + $0xd8] sm:$0xff]  ;;  %v329_v38 = vld [vmem:[%s2475_s2 + $0xc0] sm:$0xff] }
  0x22   : > { %445 = vmatprep.subr.mxu0 %v342_v24  ;;  %606 = vmatprep.subr.mxu1 %v344_v25  ;;  %v331_v39 = vld [vmem:[%s2475_s2 + $0xd0] sm:$0xff]  ;;  %v326_v40 = vld [vmem:[%s2475_s2 + $0xa8] sm:$0xff]  ;;  %v328_v41 = vld [vmem:[%s2475_s2 + $0xb8] sm:$0xff] }
  0x23   : > { %446 = vmatpush1.msra.mxu0 %v341_v26  ;;  %607 = vmatpush1.msra.mxu1 %v343_v27  ;;  %v325_v42 = vld [vmem:[%s2475_s2 + $0xa0] sm:$0xff]  ;;  %v327_v43 = vld [vmem:[%s2475_s2 + $0xb0] sm:$0xff]  ;;  %v322_v44 = vld [vmem:[%s2475_s2 + $0x88] sm:$0xff] }
  0x24   : > { %447 = vmatprep.subr.mxu0 %v338_v28  ;;  %608 = vmatprep.subr.mxu1 %v340_v29  ;;  %v324_v45 = vld [vmem:[%s2475_s2 + $0x98] sm:$0xff]  ;;  %v321_v46 = vld [vmem:[%s2475_s2 + $0x80] sm:$0xff]  ;;  %v323_v47 = vld [vmem:[%s2475_s2 + $0x90] sm:$0xff] }
  0x25   : > { %448 = vmatpush1.msra.mxu0 %v337_v30  ;;  %609 = vmatpush1.msra.mxu1 %v339_v31  ;;  %v318_v48 = vld [vmem:[%s2475_s2 + $0x68] sm:$0xff]  ;;  %v320_v49 = vld [vmem:[%s2475_s2 + $0x78] sm:$0xff]  ;;  %v317_v50 = vld [vmem:[%s2475_s2 + $0x60] sm:$0xff] }
  0x26   : > { %449 = vmatprep.subr.mxu0 %v334_v32  ;;  %610 = vmatprep.subr.mxu1 %v336_v33  ;;  %v319_v51 = vld [vmem:[%s2475_s2 + $0x70] sm:$0xff]  ;;  %v314_v52 = vld [vmem:[%s2475_s2 + $0x48] sm:$0xff]  ;;  %v316_v53 = vld [vmem:[%s2475_s2 + $0x58] sm:$0xff] }
  0x27   : > { %450 = vmatpush1.msra.mxu0 %v333_v34  ;;  %611 = vmatpush1.msra.mxu1 %v335_v35  ;;  %v313_v54 = vld [vmem:[%s2475_s2 + $0x40] sm:$0xff]  ;;  %v315_v55 = vld [vmem:[%s2475_s2 + $0x50] sm:$0xff]  ;;  %v310_v56 = vld [vmem:[%s2475_s2 + $0x28] sm:$0xff] }
  0x28   : > { %451 = vmatprep.subr.mxu0 %v330_v36  ;;  %612 = vmatprep.subr.mxu1 %v332_v37  ;;  %v312_v57 = vld [vmem:[%s2475_s2 + $0x38] sm:$0xff]  ;;  %v309_v58 = vld [vmem:[%s2475_s2 + $0x20] sm:$0xff]  ;;  %v311_v59 = vld [vmem:[%s2475_s2 + $0x30] sm:$0xff] }
  0x29   : > { %452 = vmatpush1.msra.mxu0 %v329_v38  ;;  %613 = vmatpush1.msra.mxu1 %v331_v39  ;;  %v306_v60 = vld [vmem:[%s2475_s2 + $0x8] sm:$0xff]  ;;  %v308_v61 = vld [vmem:[%s2475_s2 + $0x18] sm:$0xff]  ;;  %v305_v62 = vld [vmem:[%s2475_s2] sm:$0xff] }
  0x2a   : > { %453 = vmatprep.subr.mxu0 %v326_v40  ;;  %614 = vmatprep.subr.mxu1 %v328_v41  ;;  %v307_v63 = vld [vmem:[%s2475_s2 + $0x10] sm:$0xff]  ;;  %v430_v0 = vld [vmem:[%s2475_s2 + $0x3e8] sm:$0xff]  ;;  %v432_v1 = vld [vmem:[%s2475_s2 + $0x3f8] sm:$0xff] }
  0x2b   : > { %454 = vmatpush1.msra.mxu0 %v325_v42  ;;  %615 = vmatpush1.msra.mxu1 %v327_v43  ;;  %v429_v2 = vld [vmem:[%s2475_s2 + $0x3e0] sm:$0xff]  ;;  %v431_v3 = vld [vmem:[%s2475_s2 + $0x3f0] sm:$0xff]  ;;  %v426_v4 = vld [vmem:[%s2475_s2 + $0x3c8] sm:$0xff] }
  0x2c   : > { %455 = vmatprep.subr.mxu0 %v322_v44  ;;  %616 = vmatprep.subr.mxu1 %v324_v45  ;;  %v428_v5 = vld [vmem:[%s2475_s2 + $0x3d8] sm:$0xff]  ;;  %v425_v6 = vld [vmem:[%s2475_s2 + $0x3c0] sm:$0xff]  ;;  %v427_v7 = vld [vmem:[%s2475_s2 + $0x3d0] sm:$0xff] }
  0x2d   : > { %456 = vmatpush1.msra.mxu0 %v321_v46  ;;  %617 = vmatpush1.msra.mxu1 %v323_v47  ;;  %v422_v8 = vld [vmem:[%s2475_s2 + $0x3a8] sm:$0xff]  ;;  %v424_v9 = vld [vmem:[%s2475_s2 + $0x3b8] sm:$0xff]  ;;  %v421_v10 = vld [vmem:[%s2475_s2 + $0x3a0] sm:$0xff] }
  0x2e   : > { %457 = vmatprep.subr.mxu0 %v318_v48  ;;  %618 = vmatprep.subr.mxu1 %v320_v49  ;;  %v423_v11 = vld [vmem:[%s2475_s2 + $0x3b0] sm:$0xff]  ;;  %v418_v12 = vld [vmem:[%s2475_s2 + $0x388] sm:$0xff]  ;;  %v420_v13 = vld [vmem:[%s2475_s2 + $0x398] sm:$0xff] }
  0x2f   : > { %458 = vmatpush1.msra.mxu0 %v317_v50  ;;  %619 = vmatpush1.msra.mxu1 %v319_v51  ;;  %v417_v14 = vld [vmem:[%s2475_s2 + $0x380] sm:$0xff]  ;;  %v419_v15 = vld [vmem:[%s2475_s2 + $0x390] sm:$0xff]  ;;  %v414_v16 = vld [vmem:[%s2475_s2 + $0x368] sm:$0xff] }
  0x30   : > { %459 = vmatprep.subr.mxu0 %v314_v52  ;;  %620 = vmatprep.subr.mxu1 %v316_v53  ;;  %v416_v17 = vld [vmem:[%s2475_s2 + $0x378] sm:$0xff]  ;;  %v413_v18 = vld [vmem:[%s2475_s2 + $0x360] sm:$0xff]  ;;  %v415_v19 = vld [vmem:[%s2475_s2 + $0x370] sm:$0xff] }
  0x31   : > { %460 = vmatpush1.msra.mxu0 %v313_v54  ;;  %621 = vmatpush1.msra.mxu1 %v315_v55  ;;  %v410_v20 = vld [vmem:[%s2475_s2 + $0x348] sm:$0xff]  ;;  %v412_v21 = vld [vmem:[%s2475_s2 + $0x358] sm:$0xff]  ;;  %v409_v22 = vld [vmem:[%s2475_s2 + $0x340] sm:$0xff] }
  0x32   : > { %461 = vmatprep.subr.mxu0 %v310_v56  ;;  %622 = vmatprep.subr.mxu1 %v312_v57  ;;  %v411_v23 = vld [vmem:[%s2475_s2 + $0x350] sm:$0xff]  ;;  %v406_v24 = vld [vmem:[%s2475_s2 + $0x328] sm:$0xff]  ;;  %v408_v25 = vld [vmem:[%s2475_s2 + $0x338] sm:$0xff] }
  0x33   : > { %462 = vmatpush1.msra.mxu0 %v309_v58  ;;  %623 = vmatpush1.msra.mxu1 %v311_v59  ;;  %v405_v26 = vld [vmem:[%s2475_s2 + $0x320] sm:$0xff]  ;;  %v407_v27 = vld [vmem:[%s2475_s2 + $0x330] sm:$0xff]  ;;  %v402_v28 = vld [vmem:[%s2475_s2 + $0x308] sm:$0xff] }
  0x34   : > { %463 = vmatprep.subr.mxu0 %v306_v60  ;;  %624 = vmatprep.subr.mxu1 %v308_v61  ;;  %v404_v29 = vld [vmem:[%s2475_s2 + $0x318] sm:$0xff]  ;;  %v401_v30 = vld [vmem:[%s2475_s2 + $0x300] sm:$0xff]  ;;  %v403_v31 = vld [vmem:[%s2475_s2 + $0x310] sm:$0xff] }
  0x35   : > { %464 = vmatpush1.msra.mxu0 %v305_v62  ;;  %625 = vmatpush1.msra.mxu1 %v307_v63  ;;  %v398_v32 = vld [vmem:[%s2475_s2 + $0x2e8] sm:$0xff]  ;;  %v400_v33 = vld [vmem:[%s2475_s2 + $0x2f8] sm:$0xff]  ;;  %v397_v34 = vld [vmem:[%s2475_s2 + $0x2e0] sm:$0xff] }
  0x36   : > { %465 = vmatprep.subr.mxu0 %v430_v0  ;;  %626 = vmatprep.subr.mxu1 %v432_v1  ;;  %v399_v35 = vld [vmem:[%s2475_s2 + $0x2f0] sm:$0xff]  ;;  %v394_v36 = vld [vmem:[%s2475_s2 + $0x2c8] sm:$0xff]  ;;  %v396_v37 = vld [vmem:[%s2475_s2 + $0x2d8] sm:$0xff] }
  0x37   : > { %466 = vmatpush2.msra.mxu0 %v429_v2  ;;  %627 = vmatpush2.msra.mxu1 %v431_v3  ;;  %v393_v38 = vld [vmem:[%s2475_s2 + $0x2c0] sm:$0xff]  ;;  %v395_v39 = vld [vmem:[%s2475_s2 + $0x2d0] sm:$0xff]  ;;  %v390_v40 = vld [vmem:[%s2475_s2 + $0x2a8] sm:$0xff] }
  0x38   : > { %467 = vmatprep.subr.mxu0 %v426_v4  ;;  %628 = vmatprep.subr.mxu1 %v428_v5  ;;  %v392_v41 = vld [vmem:[%s2475_s2 + $0x2b8] sm:$0xff]  ;;  %v389_v42 = vld [vmem:[%s2475_s2 + $0x2a0] sm:$0xff]  ;;  %v391_v43 = vld [vmem:[%s2475_s2 + $0x2b0] sm:$0xff] }
  0x39   : > { %468 = vmatpush2.msra.mxu0 %v425_v6  ;;  %629 = vmatpush2.msra.mxu1 %v427_v7  ;;  %v386_v44 = vld [vmem:[%s2475_s2 + $0x288] sm:$0xff]  ;;  %v388_v45 = vld [vmem:[%s2475_s2 + $0x298] sm:$0xff]  ;;  %v385_v46 = vld [vmem:[%s2475_s2 + $0x280] sm:$0xff] }
  0x3a   : > { %469 = vmatprep.subr.mxu0 %v422_v8  ;;  %630 = vmatprep.subr.mxu1 %v424_v9  ;;  %v387_v47 = vld [vmem:[%s2475_s2 + $0x290] sm:$0xff]  ;;  %v382_v48 = vld [vmem:[%s2475_s2 + $0x268] sm:$0xff]  ;;  %v384_v49 = vld [vmem:[%s2475_s2 + $0x278] sm:$0xff] }
  0x3b   : > { %470 = vmatpush2.msra.mxu0 %v421_v10  ;;  %631 = vmatpush2.msra.mxu1 %v423_v11  ;;  %v381_v50 = vld [vmem:[%s2475_s2 + $0x260] sm:$0xff]  ;;  %v383_v51 = vld [vmem:[%s2475_s2 + $0x270] sm:$0xff]  ;;  %v378_v52 = vld [vmem:[%s2475_s2 + $0x248] sm:$0xff] }
  0x3c   : > { %471 = vmatprep.subr.mxu0 %v418_v12  ;;  %632 = vmatprep.subr.mxu1 %v420_v13  ;;  %v380_v53 = vld [vmem:[%s2475_s2 + $0x258] sm:$0xff]  ;;  %v377_v54 = vld [vmem:[%s2475_s2 + $0x240] sm:$0xff]  ;;  %v379_v55 = vld [vmem:[%s2475_s2 + $0x250] sm:$0xff] }
  0x3d   : > { %472 = vmatpush2.msra.mxu0 %v417_v14  ;;  %633 = vmatpush2.msra.mxu1 %v419_v15  ;;  %v374_v56 = vld [vmem:[%s2475_s2 + $0x228] sm:$0xff]  ;;  %v376_v57 = vld [vmem:[%s2475_s2 + $0x238] sm:$0xff]  ;;  %v373_v58 = vld [vmem:[%s2475_s2 + $0x220] sm:$0xff] }
  0x3e   : > { %473 = vmatprep.subr.mxu0 %v414_v16  ;;  %634 = vmatprep.subr.mxu1 %v416_v17  ;;  %v375_v59 = vld [vmem:[%s2475_s2 + $0x230] sm:$0xff]  ;;  %v370_v60 = vld [vmem:[%s2475_s2 + $0x208] sm:$0xff]  ;;  %v372_v61 = vld [vmem:[%s2475_s2 + $0x218] sm:$0xff] }
  0x3f   : > { %474 = vmatpush2.msra.mxu0 %v413_v18  ;;  %635 = vmatpush2.msra.mxu1 %v415_v19  ;;  %v369_v62 = vld [vmem:[%s2475_s2 + $0x200] sm:$0xff]  ;;  %v371_v0 = vld [vmem:[%s2475_s2 + $0x210] sm:$0xff]  ;;  %v290_v2 = vld [vmem:[%s1993_s23 + $0x8] sm:$0xff] }
  0x40   : > { %475 = vmatprep.subr.mxu0 %v410_v20  ;;  %636 = vmatprep.subr.mxu1 %v412_v21  ;;  %v289_v63 = vld [vmem:[%s1993_s23] sm:$0xff]  ;;  %v274_v3 = vld [vmem:[%s2011_s12 + $0x8] sm:$0xff]  ;;  %v291_v4 = vld [vmem:[%s1993_s23 + $0x10] sm:$0xff] }
  0x41   : > { %476 = vmatpush2.msra.mxu0 %v409_v22  ;;  %637 = vmatpush2.msra.mxu1 %v411_v23  ;;  %v273_v1 = vld [vmem:[%s2011_s12] sm:$0xff]  ;;  %v275_v5 = vld [vmem:[%s2011_s12 + $0x10] sm:$0xff]  ;;  %v292_v6 = vld [vmem:[%s1993_s23 + $0x18] sm:$0xff] }
  0x42   : > { %477 = vmatprep.subr.mxu0 %v406_v24  ;;  %638 = vmatprep.subr.mxu1 %v408_v25  ;;  %v276_v7 = vld [vmem:[%s2011_s12 + $0x18] sm:$0xff]  ;;  %v293_v8 = vld [vmem:[%s1993_s23 + $0x20] sm:$0xff]  ;;  %v294_v10 = vld [vmem:[%s1993_s23 + $0x28] sm:$0xff] }
  0x43   : > { %478 = vmatpush2.msra.mxu0 %v405_v26  ;;  %639 = vmatpush2.msra.mxu1 %v407_v27  ;;  %v277_v9 = vld [vmem:[%s2011_s12 + $0x20] sm:$0xff]  ;;  %v278_v11 = vld [vmem:[%s2011_s12 + $0x28] sm:$0xff]  ;;  %v295_v12 = vld [vmem:[%s1993_s23 + $0x30] sm:$0xff] }
  0x44   : > { %479 = vmatprep.subr.mxu0 %v402_v28  ;;  %640 = vmatprep.subr.mxu1 %v404_v29  ;;  %v279_v13 = vld [vmem:[%s2011_s12 + $0x30] sm:$0xff]  ;;  %v296_v14 = vld [vmem:[%s1993_s23 + $0x38] sm:$0xff]  ;;  %v297_v16 = vld [vmem:[%s1993_s23 + $0x40] sm:$0xff] }
  0x45   : > { %480 = vmatpush2.msra.mxu0 %v401_v30  ;;  %641 = vmatpush2.msra.mxu1 %v403_v31  ;;  %v280_v15 = vld [vmem:[%s2011_s12 + $0x38] sm:$0xff]  ;;  %v281_v17 = vld [vmem:[%s2011_s12 + $0x40] sm:$0xff]  ;;  %v298_v18 = vld [vmem:[%s1993_s23 + $0x48] sm:$0xff] }
  0x46   : > { %481 = vmatprep.subr.mxu0 %v398_v32  ;;  %642 = vmatprep.subr.mxu1 %v400_v33  ;;  %v282_v19 = vld [vmem:[%s2011_s12 + $0x48] sm:$0xff]  ;;  %v299_v20 = vld [vmem:[%s1993_s23 + $0x50] sm:$0xff]  ;;  %v300_v22 = vld [vmem:[%s1993_s23 + $0x58] sm:$0xff] }
  0x47   : > { %482 = vmatpush2.msra.mxu0 %v397_v34  ;;  %643 = vmatpush2.msra.mxu1 %v399_v35  ;;  %v283_v21 = vld [vmem:[%s2011_s12 + $0x50] sm:$0xff]  ;;  %v284_v23 = vld [vmem:[%s2011_s12 + $0x58] sm:$0xff]  ;;  %v301_v24 = vld [vmem:[%s1993_s23 + $0x60] sm:$0xff] }
  0x48   : > { %483 = vmatprep.subr.mxu0 %v394_v36  ;;  %644 = vmatprep.subr.mxu1 %v396_v37  ;;  %v285_v25 = vld [vmem:[%s2011_s12 + $0x60] sm:$0xff]  ;;  %v302_v26 = vld [vmem:[%s1993_s23 + $0x68] sm:$0xff]  ;;  %v303_v28 = vld [vmem:[%s1993_s23 + $0x70] sm:$0xff] }
  0x49   : > { %484 = vmatpush2.msra.mxu0 %v393_v38  ;;  %645 = vmatpush2.msra.mxu1 %v395_v39  ;;  %v286_v27 = vld [vmem:[%s2011_s12 + $0x68] sm:$0xff]  ;;  %v287_v29 = vld [vmem:[%s2011_s12 + $0x70] sm:$0xff]  ;;  %v304_v30 = vld [vmem:[%s1993_s23 + $0x78] sm:$0xff]  ;;  %s2058_s23 = scalar_lea.vmem [#allocation4], %s1336_s6 }
  0x4a   : > { %485 = vmatprep.subr.mxu0 %v390_v40  ;;  %646 = vmatprep.subr.mxu1 %v392_v41  ;;  %v288_v31 = vld [vmem:[%s2011_s12 + $0x78] sm:$0xff]  ;;  %s1436_s12 = scalar_lea.vmem %s2372_s9, 4096 }
  0x4b   : > { %486 = vmatpush2.msra.mxu0 %v389_v42  ;;  %647 = vmatpush2.msra.mxu1 %v391_v43  ;;  %p1437_p11 = scmp.ne.s32.totalorder %s2372_s9, %s1436_s12  ;;  %p1444_p1 = scmp.lt.s32.totalorder %s1442_s16, %s1436_s12 }
  0x4c   : > { %487 = vmatprep.subr.mxu0 %v386_v44  ;;  %648 = vmatprep.subr.mxu1 %v388_v45 }
  0x4d   : > { %488 = vmatpush2.msra.mxu0 %v385_v46  ;;  %649 = vmatpush2.msra.mxu1 %v387_v47  ;;  %p1438_p12 = pnand %p1437_p11, %p1600_p5  ;;  %p1445_p2 = por %p1444_p1, %p1443_p0 }
  0x4e   : > { %489 = vmatprep.subr.mxu0 %v382_v48  ;;  %650 = vmatprep.subr.mxu1 %v384_v49 }
  0x4f   : > { %490 = vmatpush2.msra.mxu0 %v381_v50  ;;  %651 = vmatpush2.msra.mxu1 %v383_v51  ;;  %p1439_p13 = pneg %p1438_p12 }
  0x50   : > { %491 = vmatprep.subr.mxu0 %v378_v52  ;;  %652 = vmatprep.subr.mxu1 %v380_v53 }
  0x51   : > { %492 = vmatpush2.msra.mxu0 %v377_v54  ;;  %653 = vmatpush2.msra.mxu1 %v379_v55  ;;  %p1446_p3 = pnand %p1445_p2, %p1439_p13 }
  0x52   : > { %493 = vmatprep.subr.mxu0 %v374_v56  ;;  %654 = vmatprep.subr.mxu1 %v376_v57 }
  0x53   : > { %494 = vmatpush2.msra.mxu0 %v373_v58  ;;  %655 = vmatpush2.msra.mxu1 %v375_v59 }
  0x54   : > { %495 = vmatprep.subr.mxu0 %v370_v60  ;;  %656 = vmatprep.subr.mxu1 %v372_v61 }
  0x55   : > { %496 = vmatpush2.msra.mxu0 %v369_v62  ;;  %497 = vmatprep.mubr.f32.mxu0 %v289_v63 }
  0x56   : > { %657 = vmatpush2.msra.mxu1 %v371_v0  ;;  %658 = vmatprep.mubr.f32.mxu1 %v289_v63 }
  0x57   : > { %498 = vmatmul.mubr.f32.vlgmr.msra.gmra.mxu0 %v273_v1  ;;  %659 = vmatmul.mubr.f32.vlgmr.msra.gmra.mxu1 %v273_v1 }
  0x58   : > { %503 = vmatprep.mubr.f32.mxu0 %v290_v2  ;;  %664 = vmatprep.mubr.f32.mxu1 %v290_v2 }
  0x5b   : > { %504 = vmatmul.mubr.f32.gmra.mxu0 %v274_v3  ;;  %665 = vmatmul.mubr.f32.gmra.mxu1 %v274_v3 }
  0x5c   : > { %509 = vmatprep.mubr.f32.mxu0 %v291_v4  ;;  %670 = vmatprep.mubr.f32.mxu1 %v291_v4 }
  0x5f   : > { %510 = vmatmul.mubr.f32.gmra.mxu0 %v275_v5  ;;  %671 = vmatmul.mubr.f32.gmra.mxu1 %v275_v5 }
  0x60   : > { %515 = vmatprep.mubr.f32.mxu0 %v292_v6  ;;  %676 = vmatprep.mubr.f32.mxu1 %v292_v6 }
  0x63   : > { %516 = vmatmul.mubr.f32.gmra.mxu0 %v276_v7  ;;  %677 = vmatmul.mubr.f32.gmra.mxu1 %v276_v7 }
  0x64   : > { %521 = vmatprep.mubr.f32.mxu0 %v293_v8  ;;  %682 = vmatprep.mubr.f32.mxu1 %v293_v8 }
  0x67   : > { %522 = vmatmul.mubr.f32.gmra.mxu0 %v277_v9  ;;  %683 = vmatmul.mubr.f32.gmra.mxu1 %v277_v9 }
  0x68   : > { %527 = vmatprep.mubr.f32.mxu0 %v294_v10  ;;  %688 = vmatprep.mubr.f32.mxu1 %v294_v10 }
  0x6b   : > { %528 = vmatmul.mubr.f32.gmra.mxu0 %v278_v11  ;;  %689 = vmatmul.mubr.f32.gmra.mxu1 %v278_v11 }
  0x6c   : > { %533 = vmatprep.mubr.f32.mxu0 %v295_v12  ;;  %694 = vmatprep.mubr.f32.mxu1 %v295_v12 }
  0x6f   : > { %534 = vmatmul.mubr.f32.gmra.mxu0 %v279_v13  ;;  %695 = vmatmul.mubr.f32.gmra.mxu1 %v279_v13 }
  0x70   : > { %539 = vmatprep.mubr.f32.mxu0 %v296_v14  ;;  %700 = vmatprep.mubr.f32.mxu1 %v296_v14 }
  0x73   : > { %540 = vmatmul.mubr.f32.gmra.mxu0 %v280_v15  ;;  %701 = vmatmul.mubr.f32.gmra.mxu1 %v280_v15 }
  0x74   : > { %545 = vmatprep.mubr.f32.mxu0 %v297_v16  ;;  %706 = vmatprep.mubr.f32.mxu1 %v297_v16 }
  0x77   : > { %546 = vmatmul.mubr.f32.gmra.mxu0 %v281_v17  ;;  %707 = vmatmul.mubr.f32.gmra.mxu1 %v281_v17 }
  0x78   : > { %551 = vmatprep.mubr.f32.mxu0 %v298_v18  ;;  %712 = vmatprep.mubr.f32.mxu1 %v298_v18 }
  0x7b   : > { %552 = vmatmul.mubr.f32.gmra.mxu0 %v282_v19  ;;  %713 = vmatmul.mubr.f32.gmra.mxu1 %v282_v19 }
  0x7c   : > { %557 = vmatprep.mubr.f32.mxu0 %v299_v20  ;;  %718 = vmatprep.mubr.f32.mxu1 %v299_v20 }
  0x7f   : > { %558 = vmatmul.mubr.f32.gmra.mxu0 %v283_v21  ;;  %719 = vmatmul.mubr.f32.gmra.mxu1 %v283_v21 }
  0x80   : > { %563 = vmatprep.mubr.f32.mxu0 %v300_v22  ;;  %724 = vmatprep.mubr.f32.mxu1 %v300_v22 }
  0x83   : > { %564 = vmatmul.mubr.f32.gmra.mxu0 %v284_v23  ;;  %725 = vmatmul.mubr.f32.gmra.mxu1 %v284_v23 }
  0x84   : > { %569 = vmatprep.mubr.f32.mxu0 %v301_v24  ;;  %730 = vmatprep.mubr.f32.mxu1 %v301_v24 }
  0x87   : > { %570 = vmatmul.mubr.f32.gmra.mxu0 %v285_v25  ;;  %731 = vmatmul.mubr.f32.gmra.mxu1 %v285_v25 }
  0x88   : > { %575 = vmatprep.mubr.f32.mxu0 %v302_v26  ;;  %736 = vmatprep.mubr.f32.mxu1 %v302_v26 }
  0x8b   : > { %576 = vmatmul.mubr.f32.gmra.mxu0 %v286_v27  ;;  %737 = vmatmul.mubr.f32.gmra.mxu1 %v286_v27 }
  0x8c   : > { %581 = vmatprep.mubr.f32.mxu0 %v303_v28  ;;  %742 = vmatprep.mubr.f32.mxu1 %v303_v28 }
  0x8f   : > { %582 = vmatmul.mubr.f32.gmra.mxu0 %v287_v29  ;;  %743 = vmatmul.mubr.f32.gmra.mxu1 %v287_v29 }
  0x90   : > { %587 = vmatprep.mubr.f32.mxu0 %v304_v30  ;;  %748 = vmatprep.mubr.f32.mxu1 %v304_v30 }
  0x93   : > { %588 = vmatmul.mubr.f32.gmra.mxu0 %v288_v31  ;;  %749 = vmatmul.mubr.f32.gmra.mxu1 %v288_v31 }
 0x117   : > { %v499_v32 = vpop.f32.mrf.mxu0  ;;  %v660_v33 = vpop.f32.mrf.mxu1 }
 0x118   : > { %1091 = vst [vmem:[%s2055_s7] sm:$0xff] %v499_v32  ;;  %1123 = vst [vmem:[%s2058_s23] sm:$0xff] %v660_v33  ;;  %v835_v36 = vmul.f32 %v499_v32, %v499_v32  ;;  %v755_v38 = vmul.f32 %v660_v33, %v499_v32  ;;  %v915_v47 = vmul.f32 %v660_v33, %v660_v33 }
 0x119   : > { %v501_v34 = vpop.f32.mrf.mxu0  ;;  %v662_v35 = vpop.f32.mrf.mxu1 }
 0x11a   : > { %1092 = vst [vmem:[%s2055_s7 + $0x8] sm:$0xff] %v501_v34  ;;  %1124 = vst [vmem:[%s2058_s23 + $0x8] sm:$0xff] %v662_v35  ;;  %v836_v37 = vmul.f32 %v501_v34, %v501_v34  ;;  %v756_v39 = vmul.f32 %v662_v35, %v501_v34  ;;  %v916_v44 = vmul.f32 %v662_v35, %v662_v35 }
 0x11b   : > { %v505_v40 = vpop.f32.mrf.mxu0  ;;  %v666_v41 = vpop.f32.mrf.mxu1 }
 0x11c   : > { %1093 = vst [vmem:[%s2055_s7 + $0x10] sm:$0xff] %v505_v40  ;;  %1125 = vst [vmem:[%s2058_s23 + $0x10] sm:$0xff] %v666_v41  ;;  %v867_v42 = vadd.f32 %v836_v37, %v835_v36  ;;  %v787_v43 = vadd.f32 %v756_v39, %v755_v38  ;;  %v757_v48 = vmul.f32 %v666_v41, %v505_v40 }
 0x11d   : > { %v507_v45 = vpop.f32.mrf.mxu0  ;;  %v668_v46 = vpop.f32.mrf.mxu1  ;;  %v947_v52 = vadd.f32 %v916_v44, %v915_v47  ;;  %v837_v57 = vmul.f32 %v505_v40, %v505_v40  ;;  %v917_v4 = vmul.f32 %v666_v41, %v666_v41 }
 0x11e   : > { %1094 = vst [vmem:[%s2055_s7 + $0x18] sm:$0xff] %v507_v45  ;;  %1126 = vst [vmem:[%s2058_s23 + $0x18] sm:$0xff] %v668_v46  ;;  %868 = vadd.xlane.f32.xlu1 %v867_v42  ;;  %788 = vadd.xlane.f32.xlu0 %v787_v43  ;;  %v758_v49 = vmul.f32 %v668_v46, %v507_v45  ;;  %v838_v54 = vmul.f32 %v507_v45, %v507_v45 }
 0x11f   : > { %v511_v50 = vpop.f32.mrf.mxu0  ;;  %v672_v51 = vpop.f32.mrf.mxu1  ;;  %v918_v62 = vmul.f32 %v668_v46, %v668_v46 }
 0x120   : > { %1095 = vst [vmem:[%s2055_s7 + $0x20] sm:$0xff] %v511_v50  ;;  %1127 = vst [vmem:[%s2058_s23 + $0x20] sm:$0xff] %v672_v51  ;;  %v790_v53 = vadd.f32 %v758_v49, %v757_v48  ;;  %v759_v58 = vmul.f32 %v672_v51, %v511_v50  ;;  %v870_v63 = vadd.f32 %v838_v54, %v837_v57 }
 0x121   : > { %v513_v55 = vpop.f32.mrf.mxu0  ;;  %v674_v56 = vpop.f32.mrf.mxu1  ;;  %v839_v5 = vmul.f32 %v511_v50, %v511_v50  ;;  %v950_v6 = vadd.f32 %v918_v62, %v917_v4  ;;  %v919_v15 = vmul.f32 %v672_v51, %v672_v51 }
 0x122   : > { %1096 = vst [vmem:[%s2055_s7 + $0x28] sm:$0xff] %v513_v55  ;;  %1128 = vst [vmem:[%s2058_s23 + $0x28] sm:$0xff] %v674_v56  ;;  %948 = vadd.xlane.f32.xlu1 %v947_v52  ;;  %791 = vadd.xlane.f32.xlu0 %v790_v53  ;;  %v760_v59 = vmul.f32 %v674_v56, %v513_v55  ;;  %v840_v1 = vmul.f32 %v513_v55, %v513_v55 }
 0x123   : > { %v517_v60 = vpop.f32.mrf.mxu0  ;;  %v678_v61 = vpop.f32.mrf.mxu1  ;;  %v920_v10 = vmul.f32 %v674_v56, %v674_v56 }
 0x124   : > { %1097 = vst [vmem:[%s2055_s7 + $0x30] sm:$0xff] %v517_v60  ;;  %1129 = vst [vmem:[%s2058_s23 + $0x30] sm:$0xff] %v678_v61  ;;  %v793_v0 = vadd.f32 %v760_v59, %v759_v58  ;;  %v873_v9 = vadd.f32 %v840_v1, %v839_v5  ;;  %v841_v11 = vmul.f32 %v517_v60, %v517_v60 }
 0x125   : > { %v519_v2 = vpop.f32.mrf.mxu0  ;;  %v680_v3 = vpop.f32.mrf.mxu1  ;;  %v921_v18 = vmul.f32 %v678_v61, %v678_v61  ;;  %v761_v20 = vmul.f32 %v678_v61, %v517_v60  ;;  %v953_v22 = vadd.f32 %v920_v10, %v919_v15 }
 0x126   : > { %871 = vadd.xlane.f32.xlu0 %v870_v63  ;;  %794 = vadd.xlane.f32.xlu1 %v793_v0  ;;  %1098 = vst [vmem:[%s2055_s7 + $0x38] sm:$0xff] %v519_v2  ;;  %1130 = vst [vmem:[%s2058_s23 + $0x38] sm:$0xff] %v680_v3  ;;  %v842_v12 = vmul.f32 %v519_v2, %v519_v2  ;;  %v922_v19 = vmul.f32 %v680_v3, %v680_v3 }
 0x127   : > { %v523_v7 = vpop.f32.mrf.mxu0  ;;  %v684_v8 = vpop.f32.mrf.mxu1  ;;  %v762_v21 = vmul.f32 %v680_v3, %v519_v2 }
 0x128   : > { %1099 = vst [vmem:[%s2055_s7 + $0x40] sm:$0xff] %v523_v7  ;;  %1131 = vst [vmem:[%s2058_s23 + $0x40] sm:$0xff] %v684_v8  ;;  %v876_v23 = vadd.f32 %v842_v12, %v841_v11  ;;  %v956_v26 = vadd.f32 %v922_v19, %v921_v18  ;;  %v843_v30 = vmul.f32 %v523_v7, %v523_v7 }
 0x129   : > { %v525_v13 = vpop.f32.mrf.mxu0  ;;  %v686_v14 = vpop.f32.mrf.mxu1  ;;  %v796_v27 = vadd.f32 %v762_v21, %v761_v20  ;;  %v763_v32 = vmul.f32 %v684_v8, %v523_v7  ;;  %v923_v38 = vmul.f32 %v684_v8, %v684_v8 }
 0x12a   : > { %951 = vadd.xlane.f32.xlu0 %v950_v6  ;;  %874 = vadd.xlane.f32.xlu1 %v873_v9  ;;  %1100 = vst [vmem:[%s2055_s7 + $0x48] sm:$0xff] %v525_v13  ;;  %1132 = vst [vmem:[%s2058_s23 + $0x48] sm:$0xff] %v686_v14  ;;  %v844_v31 = vmul.f32 %v525_v13, %v525_v13  ;;  %v764_v33 = vmul.f32 %v686_v14, %v525_v13 }
 0x12b   : > { %v529_v16 = vpop.f32.mrf.mxu0  ;;  %v690_v17 = vpop.f32.mrf.mxu1  ;;  %v924_v39 = vmul.f32 %v686_v14, %v686_v14 }
 0x12c   : > { %1101 = vst [vmem:[%s2055_s7 + $0x50] sm:$0xff] %v529_v16  ;;  %1133 = vst [vmem:[%s2058_s23 + $0x50] sm:$0xff] %v690_v17  ;;  %v879_v40 = vadd.f32 %v844_v31, %v843_v30  ;;  %v799_v41 = vadd.f32 %v764_v33, %v763_v32  ;;  %v845_v42 = vmul.f32 %v529_v16, %v529_v16 }
 0x12d   : > { %v531_v24 = vpop.f32.mrf.mxu0  ;;  %v692_v25 = vpop.f32.mrf.mxu1  ;;  %v925_v48 = vmul.f32 %v690_v17, %v690_v17  ;;  %v765_v50 = vmul.f32 %v690_v17, %v529_v16  ;;  %v959_v52 = vadd.f32 %v924_v39, %v923_v38 }
 0x12e   : > { %954 = vadd.xlane.f32.xlu1 %v953_v22  ;;  %877 = vadd.xlane.f32.xlu0 %v876_v23  ;;  %1102 = vst [vmem:[%s2055_s7 + $0x58] sm:$0xff] %v531_v24  ;;  %1134 = vst [vmem:[%s2058_s23 + $0x58] sm:$0xff] %v692_v25  ;;  %v846_v43 = vmul.f32 %v531_v24, %v531_v24  ;;  %v926_v49 = vmul.f32 %v692_v25, %v692_v25 }
 0x12f   : > { %v2083_v28 = vpop.f32.mrf.mxu0  ;;  %v2085_v29 = vpop.f32.mrf.mxu1  ;;  %v766_v51 = vmul.f32 %v692_v25, %v531_v24 }
 0x130   : > { %1103 = vst [vmem:[%s2055_s7 + $0x60] sm:$0xff] %v2083_v28  ;;  %1135 = vst [vmem:[%s2058_s23 + $0x60] sm:$0xff] %v2085_v29  ;;  %v882_v53 = vadd.f32 %v846_v43, %v845_v42  ;;  %v962_v56 = vadd.f32 %v926_v49, %v925_v48  ;;  %v847_v60 = vmul.f32 %v2083_v28, %v2083_v28 }
 0x131   : > { %v2091_v34 = vpop.f32.mrf.mxu0  ;;  %v2093_v35 = vpop.f32.mrf.mxu1  ;;  %v802_v57 = vadd.f32 %v766_v51, %v765_v50  ;;  %v927_v4 = vmul.f32 %v2085_v29, %v2085_v29 }
 0x132   : > { %957 = vadd.xlane.f32.xlu0 %v956_v26  ;;  %797 = vadd.xlane.f32.xlu1 %v796_v27  ;;  %1104 = vst [vmem:[%s2055_s7 + $0x68] sm:$0xff] %v2091_v34  ;;  %1136 = vst [vmem:[%s2058_s23 + $0x68] sm:$0xff] %v2093_v35  ;;  %v848_v61 = vmul.f32 %v2091_v34, %v2091_v34  ;;  %v928_v5 = vmul.f32 %v2093_v35, %v2093_v35 }
 0x133   : > { %v2099_v36 = vpop.f32.mrf.mxu0  ;;  %v2101_v37 = vpop.f32.mrf.mxu1 }
 0x134   : > { %1105 = vst [vmem:[%s2055_s7 + $0x70] sm:$0xff] %v2099_v36  ;;  %1137 = vst [vmem:[%s2058_s23 + $0x70] sm:$0xff] %v2101_v37  ;;  %v849_v62 = vmul.f32 %v2099_v36, %v2099_v36  ;;  %v929_v6 = vmul.f32 %v2101_v37, %v2101_v37  ;;  %v885_v8 = vadd.f32 %v848_v61, %v847_v60 }
 0x135   : > { %v2107_v44 = vpop.f32.mrf.mxu0  ;;  %v2109_v45 = vpop.f32.mrf.mxu1  ;;  %v965_v12 = vadd.f32 %v928_v5, %v927_v4 }
 0x136   : > { %880 = vadd.xlane.f32.xlu1 %v879_v40  ;;  %800 = vadd.xlane.f32.xlu0 %v799_v41  ;;  %1106 = vst [vmem:[%s2055_s7 + $0x78] sm:$0xff] %v2107_v44  ;;  %1138 = vst [vmem:[%s2058_s23 + $0x78] sm:$0xff] %v2109_v45  ;;  %v850_v63 = vmul.f32 %v2107_v44, %v2107_v44  ;;  %v930_v7 = vmul.f32 %v2109_v45, %v2109_v45 }
 0x137   : > { %v2115_v46 = vpop.f32.mrf.mxu0  ;;  %v2117_v47 = vpop.f32.mrf.mxu1 }
 0x138   : > { %1107 = vst [vmem:[%s2055_s7 + $0x80] sm:$0xff] %v2115_v46  ;;  %1139 = vst [vmem:[%s2058_s23 + $0x80] sm:$0xff] %v2117_v47  ;;  %v888_v9 = vadd.f32 %v850_v63, %v849_v62  ;;  %v968_v13 = vadd.f32 %v930_v7, %v929_v6  ;;  %v851_v16 = vmul.f32 %v2115_v46, %v2115_v46 }
 0x139   : > { %v2123_v54 = vpop.f32.mrf.mxu0  ;;  %v2125_v55 = vpop.f32.mrf.mxu1  ;;  %v931_v24 = vmul.f32 %v2117_v47, %v2117_v47 }
 0x13a   : > { %960 = vadd.xlane.f32.xlu1 %v959_v52  ;;  %883 = vadd.xlane.f32.xlu0 %v882_v53  ;;  %1108 = vst [vmem:[%s2055_s7 + $0x88] sm:$0xff] %v2123_v54  ;;  %1140 = vst [vmem:[%s2058_s23 + $0x88] sm:$0xff] %v2125_v55  ;;  %v852_v17 = vmul.f32 %v2123_v54, %v2123_v54  ;;  %v932_v25 = vmul.f32 %v2125_v55, %v2125_v55 }
 0x13b   : > { %v2131_v58 = vpop.f32.mrf.mxu0  ;;  %v2133_v59 = vpop.f32.mrf.mxu1 }
 0x13c   : > { %1109 = vst [vmem:[%s2055_s7 + $0x90] sm:$0xff] %v2131_v58  ;;  %1141 = vst [vmem:[%s2058_s23 + $0x90] sm:$0xff] %v2133_v59  ;;  %v853_v18 = vmul.f32 %v2131_v58, %v2131_v58  ;;  %v933_v26 = vmul.f32 %v2133_v59, %v2133_v59  ;;  %v891_v30 = vadd.f32 %v852_v17, %v851_v16 }
 0x13d   : > { %v2147_v0 = vpop.f32.mrf.mxu0  ;;  %v2149_v1 = vpop.f32.mrf.mxu1  ;;  %v971_v38 = vadd.f32 %v932_v25, %v931_v24 }
 0x13e   : > { %963 = vadd.xlane.f32.xlu0 %v962_v56  ;;  %803 = vadd.xlane.f32.xlu1 %v802_v57  ;;  %1110 = vst [vmem:[%s2055_s7 + $0x98] sm:$0xff] %v2147_v0  ;;  %1142 = vst [vmem:[%s2058_s23 + $0x98] sm:$0xff] %v2149_v1  ;;  %v854_v19 = vmul.f32 %v2147_v0, %v2147_v0  ;;  %v934_v27 = vmul.f32 %v2149_v1, %v2149_v1 }
 0x13f   : > { %v2155_v2 = vpop.f32.mrf.mxu0  ;;  %v2157_v3 = vpop.f32.mrf.mxu1 }
 0x140   : > { %1111 = vst [vmem:[%s2055_s7 + $0xa0] sm:$0xff] %v2155_v2  ;;  %1143 = vst [vmem:[%s2058_s23 + $0xa0] sm:$0xff] %v2157_v3  ;;  %v894_v31 = vadd.f32 %v854_v19, %v853_v18  ;;  %v974_v39 = vadd.f32 %v934_v27, %v933_v26  ;;  %v855_v42 = vmul.f32 %v2155_v2, %v2155_v2 }
 0x141   : > { %v2171_v10 = vpop.f32.mrf.mxu0  ;;  %v2173_v11 = vpop.f32.mrf.mxu1  ;;  %v935_v56 = vmul.f32 %v2157_v3, %v2157_v3 }
 0x142   : > { %886 = vadd.xlane.f32.xlu1 %v885_v8  ;;  %889 = vadd.xlane.f32.xlu0 %v888_v9  ;;  %1112 = vst [vmem:[%s2055_s7 + $0xa8] sm:$0xff] %v2171_v10  ;;  %1144 = vst [vmem:[%s2058_s23 + $0xa8] sm:$0xff] %v2173_v11  ;;  %v856_v43 = vmul.f32 %v2171_v10, %v2171_v10  ;;  %v936_v57 = vmul.f32 %v2173_v11, %v2173_v11 }
 0x143   : > { %v2179_v14 = vpop.f32.mrf.mxu0  ;;  %v2181_v15 = vpop.f32.mrf.mxu1 }
 0x144   : > { %1113 = vst [vmem:[%s2055_s7 + $0xb0] sm:$0xff] %v2179_v14  ;;  %1145 = vst [vmem:[%s2058_s23 + $0xb0] sm:$0xff] %v2181_v15  ;;  %v857_v48 = vmul.f32 %v2179_v14, %v2179_v14  ;;  %v937_v60 = vmul.f32 %v2181_v15, %v2181_v15  ;;  %v897_v62 = vadd.f32 %v856_v43, %v855_v42 }
 0x145   : > { %v2195_v20 = vpop.f32.mrf.mxu0  ;;  %v2197_v21 = vpop.f32.mrf.mxu1  ;;  %v977_v6 = vadd.f32 %v936_v57, %v935_v56 }
 0x146   : > { %966 = vadd.xlane.f32.xlu1 %v965_v12  ;;  %969 = vadd.xlane.f32.xlu0 %v968_v13  ;;  %1114 = vst [vmem:[%s2055_s7 + $0xb8] sm:$0xff] %v2195_v20  ;;  %1146 = vst [vmem:[%s2058_s23 + $0xb8] sm:$0xff] %v2197_v21  ;;  %v858_v49 = vmul.f32 %v2195_v20, %v2195_v20  ;;  %v938_v61 = vmul.f32 %v2197_v21, %v2197_v21 }
 0x147   : > { %v2203_v22 = vpop.f32.mrf.mxu0  ;;  %v2205_v23 = vpop.f32.mrf.mxu1 }
 0x148   : > { %1115 = vst [vmem:[%s2055_s7 + $0xc0] sm:$0xff] %v2203_v22  ;;  %1147 = vst [vmem:[%s2058_s23 + $0xc0] sm:$0xff] %v2205_v23  ;;  %v900_v63 = vadd.f32 %v858_v49, %v857_v48  ;;  %v980_v7 = vadd.f32 %v938_v61, %v937_v60  ;;  %v859_v12 = vmul.f32 %v2203_v22, %v2203_v22 }
 0x149   : > { %v2219_v32 = vpop.f32.mrf.mxu0  ;;  %v2221_v33 = vpop.f32.mrf.mxu1  ;;  %v939_v24 = vmul.f32 %v2205_v23, %v2205_v23 }
 0x14a   : > { %892 = vadd.xlane.f32.xlu1 %v891_v30  ;;  %895 = vadd.xlane.f32.xlu0 %v894_v31  ;;  %1116 = vst [vmem:[%s2055_s7 + $0xc8] sm:$0xff] %v2219_v32  ;;  %1148 = vst [vmem:[%s2058_s23 + $0xc8] sm:$0xff] %v2221_v33  ;;  %v860_v13 = vmul.f32 %v2219_v32, %v2219_v32  ;;  %v940_v25 = vmul.f32 %v2221_v33, %v2221_v33 }
 0x14b   : > { %v2227_v40 = vpop.f32.mrf.mxu0  ;;  %v2229_v41 = vpop.f32.mrf.mxu1 }
 0x14c   : > { %1117 = vst [vmem:[%s2055_s7 + $0xd0] sm:$0xff] %v2227_v40  ;;  %1149 = vst [vmem:[%s2058_s23 + $0xd0] sm:$0xff] %v2229_v41  ;;  %v861_v16 = vmul.f32 %v2227_v40, %v2227_v40  ;;  %v941_v26 = vmul.f32 %v2229_v41, %v2229_v41  ;;  %v903_v30 = vadd.f32 %v860_v13, %v859_v12 }
 0x14d   : > { %v2243_v50 = vpop.f32.mrf.mxu0  ;;  %v2245_v51 = vpop.f32.mrf.mxu1 }
 0x14e   : > { %972 = vadd.xlane.f32.xlu1 %v971_v38  ;;  %975 = vadd.xlane.f32.xlu0 %v974_v39  ;;  %1118 = vst [vmem:[%s2055_s7 + $0xd8] sm:$0xff] %v2243_v50  ;;  %1150 = vst [vmem:[%s2058_s23 + $0xd8] sm:$0xff] %v2245_v51  ;;  %v862_v17 = vmul.f32 %v2243_v50, %v2243_v50  ;;  %v942_v27 = vmul.f32 %v2245_v51, %v2245_v51 }
 0x14f   : > { %v2251_v52 = vpop.f32.mrf.mxu0  ;;  %v2253_v53 = vpop.f32.mrf.mxu1  ;;  %v983_v38 = vadd.f32 %v940_v25, %v939_v24  ;;  %v773_v24 = vmul.f32 %v2133_v59, %v2131_v58  ;;  %v774_v25 = vmul.f32 %v2149_v1, %v2147_v0  ;;  %v775_v58 = vmul.f32 %v2157_v3, %v2155_v2 }
 0x150   : > { %1119 = vst [vmem:[%s2055_s7 + $0xe0] sm:$0xff] %v2251_v52  ;;  %1151 = vst [vmem:[%s2058_s23 + $0xe0] sm:$0xff] %v2253_v53  ;;  %v906_v31 = vadd.f32 %v862_v17, %v861_v16  ;;  %v986_v39 = vadd.f32 %v942_v27, %v941_v26  ;;  %v863_v43 = vmul.f32 %v2251_v52, %v2251_v52 }
 0x151   : > { %v2267_v4 = vpop.f32.mrf.mxu0  ;;  %v2269_v5 = vpop.f32.mrf.mxu1  ;;  %v943_v56 = vmul.f32 %v2253_v53, %v2253_v53  ;;  %v769_v16 = vmul.f32 %v2101_v37, %v2099_v36  ;;  %v770_v17 = vmul.f32 %v2109_v45, %v2107_v44  ;;  %v814_v36 = vadd.f32 %v774_v25, %v773_v24 }
 0x152   : > { %898 = vadd.xlane.f32.xlu1 %v897_v62  ;;  %901 = vadd.xlane.f32.xlu0 %v900_v63  ;;  %1120 = vst [vmem:[%s2055_s7 + $0xe8] sm:$0xff] %v2267_v4  ;;  %1152 = vst [vmem:[%s2058_s23 + $0xe8] sm:$0xff] %v2269_v5  ;;  %v864_v48 = vmul.f32 %v2267_v4, %v2267_v4  ;;  %v944_v57 = vmul.f32 %v2269_v5, %v2269_v5 }
 0x153   : > { %v2275_v8 = vpop.f32.mrf.mxu0  ;;  %v2277_v9 = vpop.f32.mrf.mxu1  ;;  %v777_v44 = vmul.f32 %v2181_v15, %v2179_v14  ;;  %v778_v45 = vmul.f32 %v2197_v21, %v2195_v20  ;;  %v780_v59 = vmul.f32 %v2221_v33, %v2219_v32  ;;  %v784_v14 = vmul.f32 %v2269_v5, %v2267_v4 }
 0x154   : > { %1121 = vst [vmem:[%s2055_s7 + $0xf0] sm:$0xff] %v2275_v8  ;;  %1153 = vst [vmem:[%s2058_s23 + $0xf0] sm:$0xff] %v2277_v9  ;;  %v865_v49 = vmul.f32 %v2275_v8, %v2275_v8  ;;  %v909_v61 = vadd.f32 %v864_v48, %v863_v43  ;;  %v945_v63 = vmul.f32 %v2277_v9, %v2277_v9 }
 0x155   : > { %v2291_v18 = vpop.f32.mrf.mxu0  ;;  %v2293_v19 = vpop.f32.mrf.mxu1  ;;  %v989_v12 = vadd.f32 %v944_v57, %v943_v56  ;;  %v820_v0 = vadd.f32 %v778_v45, %v777_v44  ;;  %v785_v15 = vmul.f32 %v2277_v9, %v2275_v8 }
 0x156   : > { %978 = vadd.xlane.f32.xlu1 %v977_v6  ;;  %981 = vadd.xlane.f32.xlu0 %v980_v7  ;;  %1122 = vst [vmem:[%s2055_s7 + $0xf8] sm:$0xff] %v2291_v18  ;;  %1154 = vst [vmem:[%s2058_s23 + $0xf8] sm:$0xff] %v2293_v19  ;;  %v866_v42 = vmul.f32 %v2291_v18, %v2291_v18  ;;  %v946_v60 = vmul.f32 %v2293_v19, %v2293_v19 }
 0x157   : > { %v767_v6 = vmul.f32 %v2085_v29, %v2083_v28  ;;  %v768_v7 = vmul.f32 %v2093_v35, %v2091_v34  ;;  %v771_v28 = vmul.f32 %v2117_v47, %v2115_v46  ;;  %v772_v29 = vmul.f32 %v2125_v55, %v2123_v54 }
 0x158   : > { %v912_v62 = vadd.f32 %v866_v42, %v865_v49  ;;  %v992_v13 = vadd.f32 %v946_v60, %v945_v63  ;;  %v808_v34 = vadd.f32 %v770_v17, %v769_v16  ;;  %v776_v46 = vmul.f32 %v2173_v11, %v2171_v10 }
 0x159   : > { %v805_v35 = vadd.f32 %v768_v7, %v767_v6  ;;  %v811_v37 = vadd.f32 %v772_v29, %v771_v28  ;;  %v781_v47 = vmul.f32 %v2229_v41, %v2227_v40  ;;  %v782_v54 = vmul.f32 %v2245_v51, %v2243_v50 }
 0x15a   : > { %904 = vadd.xlane.f32.xlu1 %v903_v30  ;;  %907 = vadd.xlane.f32.xlu0 %v906_v31  ;;  %v779_v55 = vmul.f32 %v2205_v23, %v2203_v22  ;;  %v817_v1 = vadd.f32 %v776_v46, %v775_v58  ;;  %v786_v10 = vmul.f32 %v2293_v19, %v2291_v18 }
 0x15b   : > { %v826_v2 = vadd.f32 %v782_v54, %v781_v47  ;;  %v783_v11 = vmul.f32 %v2253_v53, %v2251_v52 }
 0x15c   : > { %v823_v3 = vadd.f32 %v780_v59, %v779_v55  ;;  %v832_v21 = vadd.f32 %v786_v10, %v785_v15 }
 0x15d   : > { %v829_v20 = vadd.f32 %v784_v14, %v783_v11 }
 0x15e   : > { %984 = vadd.xlane.f32.xlu1 %v983_v38  ;;  %987 = vadd.xlane.f32.xlu0 %v986_v39 }
 0x162   : > { %910 = vadd.xlane.f32.xlu1 %v909_v61  ;;  %913 = vadd.xlane.f32.xlu0 %v912_v62 }
 0x166   : > { %990 = vadd.xlane.f32.xlu1 %v989_v12  ;;  %993 = vadd.xlane.f32.xlu0 %v992_v13 }
 0x16a   : > { %809 = vadd.xlane.f32.xlu1 %v808_v34  ;;  %806 = vadd.xlane.f32.xlu0 %v805_v35 }
 0x16e   : > { %815 = vadd.xlane.f32.xlu1 %v814_v36  ;;  %812 = vadd.xlane.f32.xlu0 %v811_v37 }
 0x172   : > { %821 = vadd.xlane.f32.xlu1 %v820_v0  ;;  %818 = vadd.xlane.f32.xlu0 %v817_v1 }
 0x176   : > { %827 = vadd.xlane.f32.xlu1 %v826_v2  ;;  %824 = vadd.xlane.f32.xlu0 %v823_v3 }
 0x17a   : > { %830 = vadd.xlane.f32.xlu0 %v829_v20  ;;  %833 = vadd.xlane.f32.xlu1 %v832_v21 }
 0x17b   : > { %1449 = shalt.err (!%p1446_p3)
}
 0x17c   : > { %s1450_s26 = scalar_lea.hbm %s2370_s10, 4096  ;;  %s1454_s17 = scalar_lea.hbm %s2476_s3, 8192 }
 0x17d   : > { %p1451_p4 = scmp.ne.s32.totalorder %s2370_s10, %s1450_s26  ;;  %p1455_p9 = scmp.lt.s32.totalorder %s2370_s10, %s2476_s3 }
 0x17e   : > { %p1456_p10 = scmp.lt.s32.totalorder %s1454_s17, %s1450_s26 }
 0x17f   : > { %p1452_p7 = pnand %p1451_p4, %p1600_p5 }
 0x180   : > { %p1457_p11 = por %p1456_p10, %p1455_p9 }
 0x181   : > { %p1453_p8 = pneg %p1452_p7 }
 0x183   : > { %p1458_p12 = pnand %p1457_p11, %p1453_p8 }
 0x185   : > { %1461 = shalt.err (!%p1458_p12)
}
 0x186   : > { %s1529_s12 = smov 256   ;;  %s1530_s15 = smov 16  }
 0x187   : > { %1358 = dma.vmem_to_hbm [thread:$0]  (%p1600_p5), %s2372_s9, 4096, %s2370_s10, %s1156_s11, %s1529_s12, %s1529_s12, %s1530_s15  }
 0x188   : > { %s2405_s6 = scalar_lea.hbm %s2477_s4, %s1355_s8  ;;  %s1197_s7 = sshll.u32 %s2058_s23, 4  ;;  %s2408_s7 = int_to_ptr.vmem [resolvable:$true] %s1197_s7 }
 0x189   : > { %s1161_s17 = scalar_lea.sflag [#allocation5], %s2052_s30  ;;  %s1462_s14 = scalar_lea.vmem %s2408_s7, 4096 }
 0x18a   : > { %p1463_p13 = scmp.ne.s32.totalorder %s2408_s7, %s1462_s14  ;;  %s1531_s13 = smov [#allocation4]  }
 0x18b   : > { %s1466_s9 = sshll.u32 %s1531_s13, 4  ;;  %s1467_s9 = int_to_ptr.vmem [resolvable:$false] %s1466_s9 }
 0x18c   : > { %p1464_p0 = pnand %p1463_p13, %p1600_p5  ;;  %s1468_s22 = scalar_lea.vmem %s1467_s9, 8192 }
 0x18d   : > { %p1469_p2 = scmp.lt.s32.totalorder %s2408_s7, %s1467_s9  ;;  %p1470_p3 = scmp.lt.s32.totalorder %s1468_s22, %s1462_s14 }
 0x18e   : > { %p1465_p1 = pneg %p1464_p0 }
 0x18f   : > { %p1471_p4 = por %p1470_p3, %p1469_p2 }
 0x191   : > { %p1472_p7 = pnand %p1471_p4, %p1465_p1 }
 0x193   : > { %1475 = shalt.err (!%p1472_p7)
}
 0x194   : > { %s1476_s23 = scalar_lea.hbm %s2405_s6, 4096  ;;  %s1480_s10 = scalar_lea.hbm %s2477_s4, 8192 }
 0x195   : > { %p1477_p8 = scmp.ne.s32.totalorder %s2405_s6, %s1476_s23  ;;  %p1481_p11 = scmp.lt.s32.totalorder %s2405_s6, %s2477_s4 }
 0x196   : > { %p1482_p12 = scmp.lt.s32.totalorder %s1480_s10, %s1476_s23 }
 0x197   : > { %p1478_p9 = pnand %p1477_p8, %p1600_p5 }
 0x198   : > { %p1483_p13 = por %p1482_p12, %p1481_p11 }
 0x199   : > { %p1479_p10 = pneg %p1478_p9 }
 0x19b   : > { %p1484_p0 = pnand %p1483_p13, %p1479_p10 }
 0x19d   : > { %1487 = shalt.err (!%p1484_p0)
}
 0x19e   : > { %1359 = dma.vmem_to_hbm [thread:$0]  (%p1600_p5), %s2408_s7, 4096, %s2405_s6, %s1161_s17, %s1529_s12, %s1529_s12, %s1530_s15  }
 0x19f   : > { %s2438_s15 = scalar_lea.vmem %s2478_s5, %s1969_s25 }
 0x1a7   : > { %v869_v22 = vpop.xlane.xlu1 %868  ;;  %v789_v23 = vpop.xlane.xlu0 %788 }
 0x1a8   : > { %v995_v40 = vmax.f32 %v869_v22, 1e-16 }
 0x1ab   : > { %v949_v32 = vpop.xlane.xlu1 %948  ;;  %v792_v33 = vpop.xlane.xlu0 %791 }
 0x1ac   : > { %v1011_v41 = vmax.f32 %v949_v32, 1e-16 }
 0x1ae   : > { %v1027_v50 = vmul.f32 %v1011_v41, %v995_v40 }
 0x1af   : > { %v872_v51 = vpop.xlane.xlu0 %871  ;;  %v795_v52 = vpop.xlane.xlu1 %794 }
 0x1b0   : > { %1404 = vrsqrt.f32 %v1027_v50  ;;  %v996_v5 = vmax.f32 %v872_v51, 1e-16 }
 0x1b3   : > { %v952_v53 = vpop.xlane.xlu0 %951  ;;  %v875_v4 = vpop.xlane.xlu1 %874 }
 0x1b4   : > { %v1012_v8 = vmax.f32 %v952_v53, 1e-16  ;;  %v997_v26 = vmax.f32 %v875_v4, 1e-16 }
 0x1b6   : > { %v1028_v9 = vmul.f32 %v1012_v8, %v996_v5 }
 0x1b7   : > { %v955_v18 = vpop.xlane.xlu1 %954  ;;  %v878_v19 = vpop.xlane.xlu0 %877 }
 0x1b8   : > { %1406 = vrsqrt.f32 %v1028_v9  ;;  %v1013_v27 = vmax.f32 %v955_v18, 1e-16  ;;  %v998_v39 = vmax.f32 %v878_v19, 1e-16 }
 0x1ba   : > { %v1029_v30 = vmul.f32 %v1013_v27, %v997_v26 }
 0x1bb   : > { %v958_v31 = vpop.xlane.xlu0 %957  ;;  %v798_v38 = vpop.xlane.xlu1 %797 }
 0x1bc   : > { %1408 = vrsqrt.f32 %v1029_v30  ;;  %v1014_v42 = vmax.f32 %v958_v31, 1e-16 }
 0x1bd   : > { %v1405_v43 = vpop.eup %1404 }
 0x1be   : > { %v1059_v48 = vmul.f32 %v1405_v43, %v789_v23  ;;  %v1030_v49 = vmul.f32 %v1014_v42, %v998_v39 }
 0x1bf   : > { %v881_v56 = vpop.xlane.xlu1 %880  ;;  %v801_v57 = vpop.xlane.xlu0 %800 }
 0x1c0   : > { %1075 = vst [vmem:[%s2438_s15] sm:$0xff] %v1059_v48  ;;  %1410 = vrsqrt.f32 %v1030_v49  ;;  %v999_v62 = vmax.f32 %v881_v56, 1e-16 }
 0x1c3   : > { %v961_v60 = vpop.xlane.xlu1 %960  ;;  %v884_v61 = vpop.xlane.xlu0 %883 }
 0x1c4   : > { %v1015_v63 = vmax.f32 %v961_v60, 1e-16  ;;  %v1000_v17 = vmax.f32 %v884_v61, 1e-16 }
 0x1c5   : > { %v1407_v6 = vpop.eup %1406 }
 0x1c6   : > { %v1060_v7 = vmul.f32 %v1407_v6, %v792_v33  ;;  %v1031_v12 = vmul.f32 %v1015_v63, %v999_v62 }
 0x1c7   : > { %v964_v13 = vpop.xlane.xlu0 %963  ;;  %v804_v16 = vpop.xlane.xlu1 %803 }
 0x1c8   : > { %1076 = vst [vmem:[%s2438_s15 + $0x8] sm:$0xff] %v1060_v7  ;;  %1412 = vrsqrt.f32 %v1031_v12  ;;  %v1016_v24 = vmax.f32 %v964_v13, 1e-16 }
 0x1c9   : > { %v1409_v25 = vpop.eup %1408 }
 0x1ca   : > { %v1061_v28 = vmul.f32 %v1409_v25, %v795_v52  ;;  %v1032_v29 = vmul.f32 %v1016_v24, %v1000_v17 }
 0x1cb   : > { %v887_v34 = vpop.xlane.xlu1 %886  ;;  %v890_v35 = vpop.xlane.xlu0 %889 }
 0x1cc   : > { %1077 = vst [vmem:[%s2438_s15 + $0x10] sm:$0xff] %v1061_v28  ;;  %1414 = vrsqrt.f32 %v1032_v29  ;;  %v1001_v14 = vmax.f32 %v887_v34, 1e-16  ;;  %v1002_v21 = vmax.f32 %v890_v35, 1e-16 }
 0x1cd   : > { %v1411_v36 = vpop.eup %1410 }
 0x1ce   : > { %v1062_v37 = vmul.f32 %v1411_v36, %v798_v38 }
 0x1cf   : > { %v967_v44 = vpop.xlane.xlu1 %966  ;;  %v970_v45 = vpop.xlane.xlu0 %969 }
 0x1d0   : > { %1078 = vst [vmem:[%s2438_s15 + $0x18] sm:$0xff] %v1062_v37  ;;  %v1017_v10 = vmax.f32 %v967_v44, 1e-16  ;;  %v1018_v11 = vmax.f32 %v970_v45, 1e-16 }
 0x1d2   : > { %v1033_v22 = vmul.f32 %v1017_v10, %v1001_v14  ;;  %v1034_v32 = vmul.f32 %v1018_v11, %v1002_v21 }
 0x1d3   : > { %v893_v58 = vpop.xlane.xlu1 %892  ;;  %v896_v46 = vpop.xlane.xlu0 %895 }
 0x1d4   : > { %v1003_v40 = vmax.f32 %v893_v58, 1e-16  ;;  %v1004_v51 = vmax.f32 %v896_v46, 1e-16  ;;  %1416 = vrsqrt.f32 %v1033_v22 }
 0x1d5   : > { %v1413_v47 = vpop.eup %1412  ;;  %1418 = vrsqrt.f32 %v1034_v32 }
 0x1d6   : > { %v1063_v54 = vmul.f32 %v1413_v47, %v801_v57 }
 0x1d7   : > { %v973_v55 = vpop.xlane.xlu1 %972  ;;  %v976_v59 = vpop.xlane.xlu0 %975 }
 0x1d8   : > { %1079 = vst [vmem:[%s2438_s15 + $0x20] sm:$0xff] %v1063_v54  ;;  %v1019_v23 = vmax.f32 %v973_v55, 1e-16  ;;  %v1020_v33 = vmax.f32 %v976_v59, 1e-16 }
 0x1d9   : > { %v1415_v0 = vpop.eup %1414 }
 0x1da   : > { %v1064_v1 = vmul.f32 %v1415_v0, %v804_v16  ;;  %v1035_v52 = vmul.f32 %v1019_v23, %v1003_v40  ;;  %v1036_v4 = vmul.f32 %v1020_v33, %v1004_v51 }
 0x1db   : > { %v899_v2 = vpop.xlane.xlu1 %898  ;;  %v902_v3 = vpop.xlane.xlu0 %901 }
 0x1dc   : > { %1080 = vst [vmem:[%s2438_s15 + $0x28] sm:$0xff] %v1064_v1  ;;  %v1005_v8 = vmax.f32 %v899_v2, 1e-16  ;;  %v1006_v19 = vmax.f32 %v902_v3, 1e-16  ;;  %1420 = vrsqrt.f32 %v1035_v52 }
 0x1dd   : > { %1422 = vrsqrt.f32 %v1036_v4 }
 0x1df   : > { %v979_v15 = vpop.xlane.xlu1 %978  ;;  %v982_v20 = vpop.xlane.xlu0 %981 }
 0x1e0   : > { %v1021_v53 = vmax.f32 %v979_v15, 1e-16  ;;  %v1022_v5 = vmax.f32 %v982_v20, 1e-16 }
 0x1e1   : > { %v1417_v6 = vpop.eup %1416 }
 0x1e2   : > { %v1037_v26 = vmul.f32 %v1021_v53, %v1005_v8  ;;  %v1038_v30 = vmul.f32 %v1022_v5, %v1006_v19  ;;  %v1419_v13 = vpop.eup %1418 }
 0x1e3   : > { %v905_v41 = vpop.xlane.xlu1 %904  ;;  %v908_v50 = vpop.xlane.xlu0 %907 }
 0x1e4   : > { %v1007_v38 = vmax.f32 %v905_v41, 1e-16  ;;  %v1008_v43 = vmax.f32 %v908_v50, 1e-16  ;;  %1424 = vrsqrt.f32 %v1037_v26 }
 0x1e5   : > { %1426 = vrsqrt.f32 %v1038_v30 }
 0x1e7   : > { %v985_v9 = vpop.xlane.xlu1 %984  ;;  %v988_v18 = vpop.xlane.xlu0 %987 }
 0x1e8   : > { %v1023_v27 = vmax.f32 %v985_v9, 1e-16  ;;  %v1024_v31 = vmax.f32 %v988_v18, 1e-16 }
 0x1e9   : > { %v1421_v28 = vpop.eup %1420 }
 0x1ea   : > { %v1039_v48 = vmul.f32 %v1023_v27, %v1007_v38  ;;  %v1040_v49 = vmul.f32 %v1024_v31, %v1008_v43  ;;  %v1423_v29 = vpop.eup %1422 }
 0x1eb   : > { %v911_v39 = vpop.xlane.xlu1 %910  ;;  %v914_v42 = vpop.xlane.xlu0 %913 }
 0x1ec   : > { %v1009_v56 = vmax.f32 %v911_v39, 1e-16  ;;  %v1010_v61 = vmax.f32 %v914_v42, 1e-16  ;;  %1428 = vrsqrt.f32 %v1039_v48 }
 0x1ed   : > { %1430 = vrsqrt.f32 %v1040_v49 }
 0x1ef   : > { %v991_v57 = vpop.xlane.xlu1 %990  ;;  %v994_v60 = vpop.xlane.xlu0 %993 }
 0x1f0   : > { %v1025_v62 = vmax.f32 %v991_v57, 1e-16  ;;  %v1026_v63 = vmax.f32 %v994_v60, 1e-16 }
 0x1f1   : > { %v1425_v44 = vpop.eup %1424 }
 0x1f2   : > { %v1041_v7 = vmul.f32 %v1025_v62, %v1009_v56  ;;  %v1042_v12 = vmul.f32 %v1026_v63, %v1010_v61  ;;  %v1427_v45 = vpop.eup %1426 }
 0x1f3   : > { %v810_v16 = vpop.xlane.xlu1 %809  ;;  %v807_v17 = vpop.xlane.xlu0 %806 }
 0x1f4   : > { %v1066_v24 = vmul.f32 %v1419_v13, %v810_v16  ;;  %v1065_v25 = vmul.f32 %v1417_v6, %v807_v17  ;;  %1432 = vrsqrt.f32 %v1041_v7 }
 0x1f5   : > { %1434 = vrsqrt.f32 %v1042_v12 }
 0x1f6   : > { %1082 = vst [vmem:[%s2438_s15 + $0x38] sm:$0xff] %v1066_v24  ;;  %1081 = vst [vmem:[%s2438_s15 + $0x30] sm:$0xff] %v1065_v25 }
 0x1f7   : > { %v816_v34 = vpop.xlane.xlu1 %815  ;;  %v813_v35 = vpop.xlane.xlu0 %812 }
 0x1f8   : > { %v1068_v36 = vmul.f32 %v1423_v29, %v816_v34  ;;  %v1067_v37 = vmul.f32 %v1421_v28, %v813_v35 }
 0x1f9   : > { %v1429_v55 = vpop.eup %1428 }
 0x1fa   : > { %1084 = vst [vmem:[%s2438_s15 + $0x48] sm:$0xff] %v1068_v36  ;;  %1083 = vst [vmem:[%s2438_s15 + $0x40] sm:$0xff] %v1067_v37  ;;  %v1431_v59 = vpop.eup %1430 }
 0x1fb   : > { %v822_v58 = vpop.xlane.xlu1 %821  ;;  %v819_v46 = vpop.xlane.xlu0 %818 }
 0x1fc   : > { %v1070_v47 = vmul.f32 %v1427_v45, %v822_v58  ;;  %v1069_v54 = vmul.f32 %v1425_v44, %v819_v46 }
 0x1fe   : > { %1086 = vst [vmem:[%s2438_s15 + $0x58] sm:$0xff] %v1070_v47  ;;  %1085 = vst [vmem:[%s2438_s15 + $0x50] sm:$0xff] %v1069_v54 }
 0x1ff   : > { %v828_v0 = vpop.xlane.xlu1 %827  ;;  %v825_v1 = vpop.xlane.xlu0 %824 }
 0x200   : > { %v1072_v2 = vmul.f32 %v1431_v59, %v828_v0  ;;  %v1071_v3 = vmul.f32 %v1429_v55, %v825_v1 }
 0x201   : > { %v1433_v10 = vpop.eup %1432 }
 0x202   : > { %1088 = vst [vmem:[%s2438_s15 + $0x68] sm:$0xff] %v1072_v2  ;;  %1087 = vst [vmem:[%s2438_s15 + $0x60] sm:$0xff] %v1071_v3  ;;  %v1435_v11 = vpop.eup %1434 }
 0x203   : > { %v831_v14 = vpop.xlane.xlu0 %830  ;;  %v834_v15 = vpop.xlane.xlu1 %833 }
 0x204   : > { %v1073_v20 = vmul.f32 %v1433_v10, %v831_v14  ;;  %v1074_v21 = vmul.f32 %v1435_v11, %v834_v15 }
 0x206   : > { %1089 = vst [vmem:[%s2438_s15 + $0x70] sm:$0xff] %v1073_v20  ;;  %1090 = vst [vmem:[%s2438_s15 + $0x78] sm:$0xff] %v1074_v21 }
 0x207 PF: > { %p1369_p5 = scmp.ge.s32.totalorder %s1526_s21, 2  ;;  %s1216_s25 = sand.u32 1, %s1514_s18  }
 0x208   : > { %s1217_s26 = scalar_lea.sflag [#allocation3], %s1216_s25 }
 0x209   : > { %p1363_p1 = pnand %p1369_p5, %p1604_p6 }
 0x20b   : > { %p1364_p2 = pneg %p1363_p1 }
 0x20d   : > { %1505 = dma.done.wait (%p1364_p2), %s1217_s26, 4096  }
 0x20e   : > { %1507 = vsyncadd (%p1364_p2), %s1217_s26, 4294963200  ;;  %s1226_s6 = scalar_lea.sflag [#allocation5], %s1216_s25 }
 0x20f   : > { %1509 = dma.done.wait (%p1364_p2), %s1226_s6, 4096  }
 0x210   : > { %1511 = vsyncadd (%p1364_p2), %s1226_s6, 4294963200  ;;  %p19_p3 = scmp.ge.s32.totalorder %s1587_s24, 4   ;;  %s2482_s18 = smov %s1518_s19 }
 0x211   : > { %s2483_s19 = smov %s1522_s20  ;;  %s2484_s20 = smov %s1598_s27 }
 0x212   : > { %s2485_s21 = smov %s1587_s24  ;;  %21 = sbr.rel (!%p19_p3) target bundleno = 5 (0x5), region = 99 }
 0x217   :  { %1239 = vsyncpa [#allocation3], 1 }
 0x218   :  { %1241 = vsyncpa [#allocation3 + $0x1], 1 }
 0x219   :  { %1242 = vsyncpa [#allocation5], 1 }
 0x21a   :  { %1244 = vsyncpa [#allocation5 + $0x1], 1 }

</bundles_post_ra>
